<compile_context>
chip_gen: v5e
topology: v5e:2x2
jax: 0.10.0
libtpu: 0.0.40
codegen_flags: <defaults>
</compile_context>

<pallas_src>
import jax
import jax.numpy as jnp
from jax.experimental import pallas as pl
from jax.experimental.pallas import tpu as pltpu


def svdpp_kernel(scal_ref, pu_ref, qi_ref, y_ref, out_ref):
    # Shapes (batch on the LANE axis):
    #   scal_ref (8, tb)      row 0: bu + bi, row 1: |Ru| (float), rows 2..7 unused
    #   pu_ref   (F, tb)      user factors (transposed)
    #   qi_ref   (F, tb)      item factors (transposed)
    #   y_ref    (F, L, tb)   gathered y_factors rows for Ru (padded slots -> row 0)
    #   out_ref  (1, tb)      predictions
    bias = scal_ref[0:1, :]                                     # (1, tb)
    lens = scal_ref[1:2, :]                                     # (1, tb)

    F = y_ref.shape[0]
    L = y_ref.shape[1]
    tb = y_ref.shape[2]

    # Masked sum over the <= L interaction rows.  Static Python loop with
    # constant l: each iteration is one static-strided (F, tb) load, keeping
    # the live set ~O(F*tb) instead of the full (F, L, tb) block.
    acc = jnp.zeros((F, tb), jnp.float32)
    for l in range(L):
        m_l = (lens > float(l)).astype(jnp.float32)             # (1, tb) in-kernel mask
        acc = acc + y_ref[:, l, :] * m_l

    # Mean over |Ru|; rows with empty Ru have acc == 0, so 0 / 1 == 0.
    y_mean = acc / jnp.maximum(lens, 1.0)                        # (F, tb)

    pu_hat = pu_ref[...] + y_mean                                # (F, tb)
    dot = jnp.sum(pu_hat * qi_ref[...], axis=0, keepdims=True)   # (1, tb)
    out_ref[...] = bias + dot


def _choose_tb(batch, max_tb=512, min_steps=2):
    """Largest lane tile in {128, 256, 512} that keeps >= min_steps grid steps."""
    tb = 128
    while tb * 2 <= max_tb and int(pl.cdiv(batch, tb * 2)) >= min_steps:
        tb *= 2
    return tb


def svdpp_forward(params, u, i, ru_pad, ru_len, *, max_tb=512):
    """params: dict of embedding tables. u, i: (B,) int32. ru_pad: (B, L) int32
    padded interaction sets (padding slots point at row 0), ru_len: (B,) int32
    valid lengths."""
    B = u.shape[0]
    L = ru_pad.shape[1]
    F = params["user_factors"].shape[1]

    # Lane tile + batch padding (padding rows reuse index 0 with empty Ru and
    # their predictions are discarded).
    tb = _choose_tb(B, max_tb=max_tb)
    nb = int(pl.cdiv(B, tb))
    Bp = nb * tb
    pad = Bp - B
    if pad:
        u = jnp.concatenate([u, jnp.zeros((pad,), u.dtype)])
        i = jnp.concatenate([i, jnp.zeros((pad,), i.dtype)])
        ru_pad = jnp.concatenate([ru_pad, jnp.zeros((pad, L), ru_pad.dtype)], axis=0)
        ru_len = jnp.concatenate([ru_len, jnp.zeros((pad,), ru_len.dtype)])

    # XLA-side glue: gather embedding rows straight into the kernel layout
    # (batch on lanes).  Only the *small* tables get a transposed view; the
    # large gathered (F, L, Bp) y operand is written once by the gather and
    # read once by the kernel -- no materialized full-size transpose.
    bias = params["user_bias"][u, 0] + params["item_bias"][i, 0]          # (Bp,)
    lens = jnp.minimum(ru_len, L).astype(jnp.float32)                     # (Bp,)
    scal = jnp.zeros((8, Bp), jnp.float32).at[0].set(bias).at[1].set(lens)

    pu_t = params["user_factors"].T[:, u]                                 # (F, Bp)
    qi_t = params["item_factors"].T[:, i]                                 # (F, Bp)
    y_t = params["y_factors"].T[:, ru_pad.T]                              # (F, L, Bp)

    # Explicit VMEM budget from the real (double-buffered) block sizes; tiny
    # relative to every generation's scoped VMEM (v7x included).
    block_bytes = 4 * tb * (8 + F + F + F * L + 1)
    vmem_limit = max(8 * 1024 * 1024, 4 * block_bytes)

    out = pl.pallas_call(
        svdpp_kernel,
        out_shape=jax.ShapeDtypeStruct((1, Bp), jnp.float32),
        grid=(nb,),
        in_specs=[
            pl.BlockSpec((8, tb), lambda g: (0, g)),            # packed scalars
            pl.BlockSpec((F, tb), lambda g: (0, g)),            # pu^T
            pl.BlockSpec((F, tb), lambda g: (0, g)),            # qi^T
            pl.BlockSpec((F, L, tb), lambda g: (0, 0, g)),      # gathered y_factors
        ],
        out_specs=pl.BlockSpec((1, tb), lambda g: (0, g)),
        compiler_params=pltpu.CompilerParams(
            dimension_semantics=("parallel",),
            vmem_limit_bytes=vmem_limit,
        ),
    )(scal, pu_t, qi_t, y_t)
    return out[0, :B]                                           # (B,) like PyTorch preds


def ref_forward(params, u, i, ru_pad, ru_len):
    """Pure-JAX reference reproducing the PyTorch forward semantics."""
    L = ru_pad.shape[1]
    bu = params["user_bias"][u][:, 0]
    bi = params["item_bias"][i][:, 0]
    pu = params["user_factors"][u]
    qi = params["item_factors"][i]
    mask = (jnp.arange(L)[None, :] < ru_len[:, None]).astype(jnp.float32)
    y_g = params["y_factors"][ru_pad]                           # (B, L, F)
    cnt = mask.sum(axis=1, keepdims=True)
    y_sum = (y_g * mask[:, :, None]).sum(axis=1) / jnp.maximum(cnt, 1.0)
    y_sum = jnp.where(cnt > 0, y_sum, 0.0)
    return bu + bi + ((pu + y_sum) * qi).sum(axis=1)


if __name__ == "__main__":
    # Small, deterministic problem.  B is NOT a multiple of 128 on purpose
    # (exercises the padding path); tb resolves to 128 -> 2 grid steps.
    n_users, n_items, n_factors = 64, 512, 32
    B, L = 200, 8

    key = jax.random.PRNGKey(0)
    k = jax.random.split(key, 8)
    params = {
        "user_bias":    0.01 * jax.random.normal(k[0], (n_users, 1), jnp.float32),
        "item_bias":    0.01 * jax.random.normal(k[1], (n_items, 1), jnp.float32),
        "user_factors": 0.01 * jax.random.normal(k[2], (n_users, n_factors), jnp.float32),
        "item_factors": 0.01 * jax.random.normal(k[3], (n_items, n_factors), jnp.float32),
        "y_factors":    0.01 * jax.random.normal(k[4], (n_items, n_factors), jnp.float32),
    }

    u = jax.random.randint(k[5], (B,), 0, n_users, dtype=jnp.int32)
    i = jax.random.randint(k[6], (B,), 0, n_items, dtype=jnp.int32)

    # Ragged Ru, represented as padded indices + lengths (some rows empty).
    k7a, k7b = jax.random.split(k[7])
    ru_len = jax.random.randint(k7a, (B,), 0, L + 1, dtype=jnp.int32)
    ru_raw = jax.random.randint(k7b, (B, L), 0, n_items, dtype=jnp.int32)
    valid = jnp.arange(L, dtype=jnp.int32)[None, :] < ru_len[:, None]
    ru_pad = jnp.where(valid, ru_raw, 0)                        # padding index 0 (masked out)

    preds = svdpp_forward(params, u, i, ru_pad, ru_len)
    jax.block_until_ready(preds)

    expected = ref_forward(params, u, i, ru_pad, ru_len)
    assert preds.shape == (B,)
    assert jnp.allclose(preds, expected, atol=1e-5, rtol=1e-5), (
        float(jnp.max(jnp.abs(preds - expected))))
    print("KERNEL_OK")
</pallas_src>

<mosaic_0001>
module attributes {stable_mosaic.version = 11 : i64} {
  func.func @svdpp_kernel(%arg0: i32, %arg1: memref<8x128xf32, #tpu.memory_space<vmem>>, %arg2: memref<32x128xf32, #tpu.memory_space<vmem>>, %arg3: memref<32x128xf32, #tpu.memory_space<vmem>>, %arg4: memref<32x8x128xf32, #tpu.memory_space<vmem>>, %arg5: memref<1x128xf32, #tpu.memory_space<vmem>>) attributes {dimension_semantics = [#tpu.dimension_semantics<parallel>], iteration_bounds = array<i64: 2>, scalar_prefetch = 0 : i64, scratch_operands = 0 : i64, tpu.core_type = #tpu.core_type<tc>, window_params = [{transform_indices = @transform_0, window_bounds = array<i64: 8, 128>}, {transform_indices = @transform_1, window_bounds = array<i64: 32, 128>}, {transform_indices = @transform_2, window_bounds = array<i64: 32, 128>}, {transform_indices = @transform_3, window_bounds = array<i64: 32, 8, 128>}, {transform_indices = @transform_4, window_bounds = array<i64: 1, 128>}]} {
    %c0 = arith.constant 0 : index
    %c0_0 = arith.constant 0 : index
    %0 = vector.load %arg1[%c0, %c0_0] : memref<8x128xf32, #tpu.memory_space<vmem>>, vector<1x128xf32>
    %c1 = arith.constant 1 : index
    %c0_1 = arith.constant 0 : index
    %1 = vector.load %arg1[%c1, %c0_1] : memref<8x128xf32, #tpu.memory_space<vmem>>, vector<1x128xf32>
    %cst = arith.constant 0.000000e+00 : f32
    %2 = vector.broadcast %cst : f32 to vector<32x128xf32>
    %cst_2 = arith.constant 0.000000e+00 : f32
    %3 = vector.broadcast %cst_2 : f32 to vector<1x128xf32>
    %4 = arith.cmpf ogt, %1, %3 : vector<1x128xf32>
    %5 = arith.extui %4 : vector<1x128xi1> to vector<1x128xi32>
    %6 = arith.sitofp %5 : vector<1x128xi32> to vector<1x128xf32>
    %c0_3 = arith.constant 0 : index
    %c0_4 = arith.constant 0 : index
    %c0_5 = arith.constant 0 : index
    %7 = vector.load %arg4[%c0_3, %c0_4, %c0_5] : memref<32x8x128xf32, #tpu.memory_space<vmem>>, vector<32x1x128xf32>
    %8 = vector.shape_cast %7 : vector<32x1x128xf32> to vector<32x128xf32>
    %9 = vector.broadcast %6 : vector<1x128xf32> to vector<32x128xf32>
    %10 = arith.mulf %8, %9 : vector<32x128xf32>
    %11 = arith.addf %2, %10 : vector<32x128xf32>
    %cst_6 = arith.constant 1.000000e+00 : f32
    %12 = vector.broadcast %cst_6 : f32 to vector<1x128xf32>
    %13 = arith.cmpf ogt, %1, %12 : vector<1x128xf32>
    %14 = arith.extui %13 : vector<1x128xi1> to vector<1x128xi32>
    %15 = arith.sitofp %14 : vector<1x128xi32> to vector<1x128xf32>
    %c0_7 = arith.constant 0 : index
    %c1_8 = arith.constant 1 : index
    %c0_9 = arith.constant 0 : index
    %16 = vector.load %arg4[%c0_7, %c1_8, %c0_9] : memref<32x8x128xf32, #tpu.memory_space<vmem>>, vector<32x1x128xf32>
    %17 = vector.shape_cast %16 : vector<32x1x128xf32> to vector<32x128xf32>
    %18 = vector.broadcast %15 : vector<1x128xf32> to vector<32x128xf32>
    %19 = arith.mulf %17, %18 : vector<32x128xf32>
    %20 = arith.addf %11, %19 : vector<32x128xf32>
    %cst_10 = arith.constant 2.000000e+00 : f32
    %21 = vector.broadcast %cst_10 : f32 to vector<1x128xf32>
    %22 = arith.cmpf ogt, %1, %21 : vector<1x128xf32>
    %23 = arith.extui %22 : vector<1x128xi1> to vector<1x128xi32>
    %24 = arith.sitofp %23 : vector<1x128xi32> to vector<1x128xf32>
    %c0_11 = arith.constant 0 : index
    %c2 = arith.constant 2 : index
    %c0_12 = arith.constant 0 : index
    %25 = vector.load %arg4[%c0_11, %c2, %c0_12] : memref<32x8x128xf32, #tpu.memory_space<vmem>>, vector<32x1x128xf32>
    %26 = vector.shape_cast %25 : vector<32x1x128xf32> to vector<32x128xf32>
    %27 = vector.broadcast %24 : vector<1x128xf32> to vector<32x128xf32>
    %28 = arith.mulf %26, %27 : vector<32x128xf32>
    %29 = arith.addf %20, %28 : vector<32x128xf32>
    %cst_13 = arith.constant 3.000000e+00 : f32
    %30 = vector.broadcast %cst_13 : f32 to vector<1x128xf32>
    %31 = arith.cmpf ogt, %1, %30 : vector<1x128xf32>
    %32 = arith.extui %31 : vector<1x128xi1> to vector<1x128xi32>
    %33 = arith.sitofp %32 : vector<1x128xi32> to vector<1x128xf32>
    %c0_14 = arith.constant 0 : index
    %c3 = arith.constant 3 : index
    %c0_15 = arith.constant 0 : index
    %34 = vector.load %arg4[%c0_14, %c3, %c0_15] : memref<32x8x128xf32, #tpu.memory_space<vmem>>, vector<32x1x128xf32>
    %35 = vector.shape_cast %34 : vector<32x1x128xf32> to vector<32x128xf32>
    %36 = vector.broadcast %33 : vector<1x128xf32> to vector<32x128xf32>
    %37 = arith.mulf %35, %36 : vector<32x128xf32>
    %38 = arith.addf %29, %37 : vector<32x128xf32>
    %cst_16 = arith.constant 4.000000e+00 : f32
    %39 = vector.broadcast %cst_16 : f32 to vector<1x128xf32>
    %40 = arith.cmpf ogt, %1, %39 : vector<1x128xf32>
    %41 = arith.extui %40 : vector<1x128xi1> to vector<1x128xi32>
    %42 = arith.sitofp %41 : vector<1x128xi32> to vector<1x128xf32>
    %c0_17 = arith.constant 0 : index
    %c4 = arith.constant 4 : index
    %c0_18 = arith.constant 0 : index
    %43 = vector.load %arg4[%c0_17, %c4, %c0_18] : memref<32x8x128xf32, #tpu.memory_space<vmem>>, vector<32x1x128xf32>
    %44 = vector.shape_cast %43 : vector<32x1x128xf32> to vector<32x128xf32>
    %45 = vector.broadcast %42 : vector<1x128xf32> to vector<32x128xf32>
    %46 = arith.mulf %44, %45 : vector<32x128xf32>
    %47 = arith.addf %38, %46 : vector<32x128xf32>
    %cst_19 = arith.constant 5.000000e+00 : f32
    %48 = vector.broadcast %cst_19 : f32 to vector<1x128xf32>
    %49 = arith.cmpf ogt, %1, %48 : vector<1x128xf32>
    %50 = arith.extui %49 : vector<1x128xi1> to vector<1x128xi32>
    %51 = arith.sitofp %50 : vector<1x128xi32> to vector<1x128xf32>
    %c0_20 = arith.constant 0 : index
    %c5 = arith.constant 5 : index
    %c0_21 = arith.constant 0 : index
    %52 = vector.load %arg4[%c0_20, %c5, %c0_21] : memref<32x8x128xf32, #tpu.memory_space<vmem>>, vector<32x1x128xf32>
    %53 = vector.shape_cast %52 : vector<32x1x128xf32> to vector<32x128xf32>
    %54 = vector.broadcast %51 : vector<1x128xf32> to vector<32x128xf32>
    %55 = arith.mulf %53, %54 : vector<32x128xf32>
    %56 = arith.addf %47, %55 : vector<32x128xf32>
    %cst_22 = arith.constant 6.000000e+00 : f32
    %57 = vector.broadcast %cst_22 : f32 to vector<1x128xf32>
    %58 = arith.cmpf ogt, %1, %57 : vector<1x128xf32>
    %59 = arith.extui %58 : vector<1x128xi1> to vector<1x128xi32>
    %60 = arith.sitofp %59 : vector<1x128xi32> to vector<1x128xf32>
    %c0_23 = arith.constant 0 : index
    %c6 = arith.constant 6 : index
    %c0_24 = arith.constant 0 : index
    %61 = vector.load %arg4[%c0_23, %c6, %c0_24] : memref<32x8x128xf32, #tpu.memory_space<vmem>>, vector<32x1x128xf32>
    %62 = vector.shape_cast %61 : vector<32x1x128xf32> to vector<32x128xf32>
    %63 = vector.broadcast %60 : vector<1x128xf32> to vector<32x128xf32>
    %64 = arith.mulf %62, %63 : vector<32x128xf32>
    %65 = arith.addf %56, %64 : vector<32x128xf32>
    %cst_25 = arith.constant 7.000000e+00 : f32
    %66 = vector.broadcast %cst_25 : f32 to vector<1x128xf32>
    %67 = arith.cmpf ogt, %1, %66 : vector<1x128xf32>
    %68 = arith.extui %67 : vector<1x128xi1> to vector<1x128xi32>
    %69 = arith.sitofp %68 : vector<1x128xi32> to vector<1x128xf32>
    %c0_26 = arith.constant 0 : index
    %c7 = arith.constant 7 : index
    %c0_27 = arith.constant 0 : index
    %70 = vector.load %arg4[%c0_26, %c7, %c0_27] : memref<32x8x128xf32, #tpu.memory_space<vmem>>, vector<32x1x128xf32>
    %71 = vector.shape_cast %70 : vector<32x1x128xf32> to vector<32x128xf32>
    %72 = vector.broadcast %69 : vector<1x128xf32> to vector<32x128xf32>
    %73 = arith.mulf %71, %72 : vector<32x128xf32>
    %74 = arith.addf %65, %73 : vector<32x128xf32>
    %cst_28 = arith.constant 1.000000e+00 : f32
    %75 = vector.broadcast %cst_28 : f32 to vector<1x128xf32>
    %76 = arith.maximumf %1, %75 : vector<1x128xf32>
    %77 = vector.broadcast %76 : vector<1x128xf32> to vector<32x128xf32>
    %78 = arith.divf %74, %77 : vector<32x128xf32>
    %c0_29 = arith.constant 0 : index
    %c0_30 = arith.constant 0 : index
    %79 = vector.load %arg2[%c0_29, %c0_30] : memref<32x128xf32, #tpu.memory_space<vmem>>, vector<32x128xf32>
    %80 = arith.addf %79, %78 : vector<32x128xf32>
    %c0_31 = arith.constant 0 : index
    %c0_32 = arith.constant 0 : index
    %81 = vector.load %arg3[%c0_31, %c0_32] : memref<32x128xf32, #tpu.memory_space<vmem>>, vector<32x128xf32>
    %82 = arith.mulf %80, %81 : vector<32x128xf32>
    %cst_33 = arith.constant dense<0.000000e+00> : vector<128xf32>
    %83 = vector.multi_reduction <add>, %82, %cst_33 [0] : vector<32x128xf32> to vector<128xf32>
    %84 = vector.shape_cast %83 : vector<128xf32> to vector<1x128xf32>
    %85 = arith.addf %0, %84 : vector<1x128xf32>
    %c0_34 = arith.constant 0 : index
    %c0_35 = arith.constant 0 : index
    %86 = vector.load %arg5[%c0_34, %c0_35] : memref<1x128xf32, #tpu.memory_space<vmem>>, vector<1x128xf32>
    tpu.vector_store %arg5[%c0_34, %c0_35], %85 {strides = array<i32>} : memref<1x128xf32, #tpu.memory_space<vmem>>, vector<1x128xf32>,
    return
  }
  func.func @transform_0(%arg0: i32) -> (i32, i32) {
    %c0_i32 = arith.constant 0 : i32
    %c0_i32_0 = arith.constant 0 : i32
    return %c0_i32, %arg0 : i32, i32
  }
  func.func @transform_1(%arg0: i32) -> (i32, i32) {
    %c0_i32 = arith.constant 0 : i32
    %c0_i32_0 = arith.constant 0 : i32
    return %c0_i32, %arg0 : i32, i32
  }
  func.func @transform_2(%arg0: i32) -> (i32, i32) {
    %c0_i32 = arith.constant 0 : i32
    %c0_i32_0 = arith.constant 0 : i32
    return %c0_i32, %arg0 : i32, i32
  }
  func.func @transform_3(%arg0: i32) -> (i32, i32, i32) {
    %c0_i32 = arith.constant 0 : i32
    %c0_i32_0 = arith.constant 0 : i32
    %c0_i32_1 = arith.constant 0 : i32
    return %c0_i32, %c0_i32_0, %arg0 : i32, i32, i32
  }
  func.func @transform_4(%arg0: i32) -> (i32, i32) {
    %c0_i32 = arith.constant 0 : i32
    %c0_i32_0 = arith.constant 0 : i32
    return %c0_i32, %arg0 : i32, i32
  }
}

</mosaic_0001>

<bundles_post_ra>
// kernel: tpu_custom_call.1
= control target key start
LH: loop header
LB: loop body
LE: loop exit
PB: predicated region body
PF: predicated region fallthrough
CT: control target
= control target key end

     0   :  { %s3307_s0 = inlined_call_operand.hbm [shape: f32[8,256], index: 0, kind: input, shape index: {}]   ;;  %s3308_s1 = inlined_call_operand.hbm [shape: f32[32,256], index: 1, kind: input, shape index: {}]   ;;  %s3309_s2 = inlined_call_operand.hbm [shape: f32[32,256], index: 2, kind: input, shape index: {}]   ;;  %s3310_s3 = inlined_call_operand.hbm [shape: f32[32,8,256], index: 3, kind: input, shape index: {}]   ;;  %s3311_s4 = inlined_call_operand.hbm [shape: f32[1,256], index: 4, kind: output, shape index: {}]  }
   0x1   :  { %3330 = sst [smem:[#allocation32_spill]] %s3307_s0 }
   0x2   :  { %3331 = sst [smem:[#allocation33_spill]] %s3308_s1 }
   0x3   :  { %9 = vsyncpa [#allocation3], 0 }
   0x4   :  { %11 = vsyncpa [#allocation3 + $0x1], 0 }
   0x5   :  { %12 = vsyncpa [#allocation6], 0 }
   0x6   :  { %14 = vsyncpa [#allocation6 + $0x1], 0 }
   0x7   :  { %15 = vsyncpa [#allocation9], 0 }
   0x8   :  { %17 = vsyncpa [#allocation9 + $0x1], 0 }
   0x9   :  { %18 = vsyncpa [#allocation4], 0 }
   0xa   :  { %20 = vsyncpa [#allocation4 + $0x1], 0  ;;  %s1774_s15 = smov 0   ;;  %s1776_s16 = smov 0  }
   0xb   :  { %s1778_s17 = smov 0   ;;  %s1780_s18 = smov 0  }
   0xc LB: > { %3332 = sst [smem:[#allocation15_spill]] %s1739_s17  ;;  %s1795_s19 = sadd.s32 4294967295, %s1743_s18   ;;  %s1743_s18 = sphi %s1780_s18, %s3523_s18   ;;  %s1739_s17 = sphi %s1778_s17, %s3525_s17   ;;  %s1735_s16 = sphi %s1776_s16, %s3527_s16   ;;  %s1731_s15 = sphi %s1774_s15, %s3526_s15  }
   0xd   : > { %s1455_s20 = sadd.s32 4294967294, %s1743_s18   ;;  %s1799_s21 = sadd.s32 1, %s1743_s18  }
   0xe   : > { %3333 = sst [smem:[#allocation16_spill]] %s1799_s21  ;;  %s33_s22 = sadd.s32 1, %s1739_s17 }
   0xf   : > { %s30_s23 = ssub.s32 %s1743_s18, %s1799_s21  ;;  %p40_p0 = scmp.ne.s32.totalorder %s1739_s17, %s1735_s16 }
  0x10   : > { %p31_p1 = scmp.eq.s32.totalorder %s30_s23, 0  ;;  %p41_p2 = scmp.eq.s32.totalorder %s1743_s18, 0 }
  0x11   : > { %p46_p3 = scmp.ne.s32.totalorder %s1735_s16, %s1731_s15  ;;  %p47_p4 = scmp.eq.s32.totalorder %s1795_s19, 0 }
  0x12   : > { %s1811_s24 = scalar_select %p31_p1, %s1739_s17, %s33_s22  }
  0x13   : > { %p42_p5 = por %p41_p2, %p40_p0  ;;  %p1813_p6 = por %p47_p4, %p46_p3 }
  0x14   : > { %3334 = sst [smem:[#allocation17_spill]] %s1811_s24  ;;  %p148_p7 = scmp.eq.s32.totalorder %s1795_s19, 1 }
  0x15   : > { %p154_p8 = scmp.eq.s32.totalorder %s1455_s20, 1  ;;  %p1457_p9 = scmp.ge.s32.totalorder %s1743_s18, 2 }
  0x16   : > { %p1508_p10 = scmp.lt.s32.totalorder %s1743_s18, 2  ;;  %p1820_p11 = por %p148_p7, %p40_p0 }
  0x17   : > { %p1824_p12 = por %p154_p8, %p46_p3  ;;  %s1829_s28 = sand.u32 1, %s1739_s17  }
  0x18   : > { %s1832_s29 = sshll.u32 %s1743_s18, 3  ;;  %p1834_p13 = pnand %p1508_p10, %p42_p5 }
  0x19   : > { %s193_s5 = sand.u32 1, %s1743_s18   ;;  %s1460_s6 = sshll.u32 %s1829_s28, 5 }
  0x1a   : > { %s3339_s1 = sld [smem:[#allocation33_spill]]  ;;  %s197_s10 = scalar_lea.vmem [#allocation5], %s1460_s6 }
  0x1b   : > { %s204_s11 = sshll.u32 %s197_s10, 4  ;;  %s1846_s13 = scalar_lea.sflag [#allocation6], %s193_s5  ;;  %s205_s11 = int_to_ptr.vmem [resolvable:$true] %s204_s11 }
  0x1c   : > { %p1553_p1 = pneg %p1834_p13 }
  0x20   : > { %s201_s9 = scalar_lea.hbm %s3339_s1, %s1832_s29  ;;  %s1556_s7 = scalar_lea.hbm %s3339_s1, 64 }
  0x21   : > { %s202_s12 = sshll.u32 %s201_s9, 4  ;;  %s203_s12 = int_to_ptr.hbm [resolvable:$true] %s202_s12 }
  0x22   : > { %s1549_s14 = sshra.s32 %s203_s12, 4  ;;  %s1550_s14 = int_to_ptr.hbm [resolvable:$true] %s1549_s14 }
  0x23   : > { %s1551_s20 = scalar_lea.hbm %s1550_s14, 32  ;;  %p1557_p4 = scmp.lt.s32.totalorder %s1550_s14, %s3339_s1 }
  0x24   : > { %p1552_p0 = scmp.ne.s32.totalorder %s1550_s14, %s1551_s20  ;;  %p1558_p5 = scmp.lt.s32.totalorder %s1556_s7, %s1551_s20 }
  0x26   : > { %p1554_p2 = pnand %p1553_p1, %p1552_p0  ;;  %p1559_p7 = por %p1558_p5, %p1557_p4 }
  0x28   : > { %p1555_p3 = pneg %p1554_p2 }
  0x2a   : > { %p1560_p8 = pnand %p1559_p7, %p1555_p3 }
  0x2c   : > { %1563 = shalt.err (!%p1560_p8)
}
  0x2d   : > { %s3313_s5 = smov 256   ;;  %s3315_s10 = smov 128  }
  0x2e   : > { %s3317_s22 = smov 8   ;;  %p1466_p10 = scmp.ge.s32.totalorder %s1743_s18, 1 }
  0x2f   : > { %1497 = dma.hbm_to_vmem [thread:$0]  (!%p1834_p13), %s203_s12, 512, %s205_s11, %s1846_s13, %s3313_s5, %s3315_s10, %s3317_s22  }
  0x30   : > { %s218_s14 = scalar_lea.vmem [#allocation7], %s1460_s6  ;;  %p254_p0 = scmp.lt.s32.totalorder %s1743_s18, 3 }
  0x31   : > { %s225_s20 = sshll.u32 %s218_s14, 4  ;;  %s1458_s7 = sshll.u32 %s1829_s28, 3  ;;  %s1869_s20 = int_to_ptr.vmem [resolvable:$true] %s225_s20 }
  0x32   : > { %p1871_p2 = pnand %p1466_p10, %p254_p0  ;;  %s3341_s0 = sld [smem:[#allocation32_spill]] }
  0x33   : > { %s178_s17 = scalar_lea.vmem [#allocation2], %s1458_s7  ;;  %s175_s6 = scalar_lea.sflag [#allocation3], %s1829_s28 }
  0x34   : > { %s186_s11 = sshll.u32 %s178_s17, 4  ;;  %s187_s11 = int_to_ptr.vmem [resolvable:$true] %s186_s11 }
  0x38   : > { %s182_s1 = scalar_lea.hbm %s3341_s0, %s1832_s29  ;;  %s1586_s22 = scalar_lea.hbm %s3341_s0, 16 }
  0x39   : > { %s184_s24 = sshll.u32 %s182_s1, 4  ;;  %s185_s24 = int_to_ptr.hbm [resolvable:$true] %s184_s24 }
  0x3a   : > { %s1579_s12 = sshra.s32 %s185_s24, 4  ;;  %s1580_s12 = int_to_ptr.hbm [resolvable:$true] %s1579_s12 }
  0x3b   : > { %s1581_s14 = scalar_lea.hbm %s1580_s12, 8  ;;  %p1587_p7 = scmp.lt.s32.totalorder %s1580_s12, %s3341_s0 }
  0x3c   : > { %p1582_p3 = scmp.ne.s32.totalorder %s1580_s12, %s1581_s14  ;;  %p1588_p8 = scmp.lt.s32.totalorder %s1586_s22, %s1581_s14 }
  0x3e   : > { %p1584_p4 = pnand %p1582_p3, %p1553_p1  ;;  %p1589_p10 = por %p1588_p8, %p1587_p7 }
  0x40   : > { %p1585_p5 = pneg %p1584_p4 }
  0x42   : > { %p1590_p0 = pnand %p1589_p10, %p1585_p5 }
  0x44   : > { %1593 = shalt.err (!%p1590_p0)
}
  0x45   : > { %1494 = dma.hbm_to_vmem [thread:$0]  (!%p1834_p13), %s185_s24, 128, %s187_s11, %s175_s6  }
  0x46   : > { %s222_s7 = scalar_lea.hbm %s3309_s2, %s1832_s29  ;;  %s1464_s10 = sshll.u32 %s1829_s28, 8 }
  0x47   : > { %s223_s5 = sshll.u32 %s222_s7, 4  ;;  %s1616_s8 = scalar_lea.hbm %s3309_s2, 64  ;;  %s224_s5 = int_to_ptr.hbm [resolvable:$true] %s223_s5 }
  0x48   : > { %s1609_s21 = sshra.s32 %s224_s5, 4  ;;  %s1610_s21 = int_to_ptr.hbm [resolvable:$true] %s1609_s21 }
  0x49   : > { %s1611_s12 = scalar_lea.hbm %s1610_s21, 32  ;;  %p1617_p7 = scmp.lt.s32.totalorder %s1610_s21, %s3309_s2 }
  0x4a   : > { %p1612_p3 = scmp.ne.s32.totalorder %s1610_s21, %s1611_s12  ;;  %p1618_p8 = scmp.lt.s32.totalorder %s1616_s8, %s1611_s12 }
  0x4c   : > { %p1614_p4 = pnand %p1612_p3, %p1553_p1  ;;  %p1619_p10 = por %p1618_p8, %p1617_p7 }
  0x4e   : > { %p1615_p5 = pneg %p1614_p4 }
  0x50   : > { %p1620_p0 = pnand %p1619_p10, %p1615_p5 }
  0x52   : > { %1623 = shalt.err (!%p1620_p0)
}
  0x53   : > { %s3342_s6 = smov 8   ;;  %s3343_s9 = smov 128  }
  0x54   : > { %s3344_s1 = smov 256   ;;  %s243_s22 = scalar_lea.hbm %s3310_s3, %s1832_s29 }
  0x55   : > { %1500 = dma.hbm_to_vmem [thread:$0]  (!%p1834_p13), %s224_s5, 512, %s1869_s20, %s1846_s13, %s3344_s1, %s3343_s9, %s3342_s6  }
  0x56   : > { %s239_s21 = scalar_lea.vmem [#allocation8], %s1464_s10  ;;  %s244_s14 = sshll.u32 %s243_s22, 4  ;;  %s245_s14 = int_to_ptr.hbm [resolvable:$true] %s244_s14 }
  0x57   : > { %s246_s12 = sshll.u32 %s239_s21, 4  ;;  %s236_s8 = scalar_lea.sflag [#allocation9], %s1829_s28  ;;  %s247_s12 = int_to_ptr.vmem [resolvable:$true] %s246_s12 }
  0x58   : > { %s1639_s24 = sshra.s32 %s245_s14, 4  ;;  %s1646_s20 = scalar_lea.hbm %s3310_s3, 512  ;;  %s1640_s24 = int_to_ptr.hbm [resolvable:$true] %s1639_s24 }
  0x59   : > { %s1641_s11 = scalar_lea.hbm %s1640_s24, 256  ;;  %p1647_p7 = scmp.lt.s32.totalorder %s1640_s24, %s3310_s3 }
  0x5a   : > { %p1642_p3 = scmp.ne.s32.totalorder %s1640_s24, %s1641_s11  ;;  %p1648_p8 = scmp.lt.s32.totalorder %s1646_s20, %s1641_s11 }
  0x5c   : > { %p1644_p4 = pnand %p1642_p3, %p1553_p1  ;;  %p1649_p10 = por %p1648_p8, %p1647_p7 }
  0x5e   : > { %p1645_p5 = pneg %p1644_p4 }
  0x60   : > { %p1650_p0 = pnand %p1649_p10, %p1645_p5 }
  0x62   : > { %1653 = shalt.err (!%p1650_p0)
}
  0x63   : > { %1503 = dma.hbm_to_vmem [thread:$0]  (!%p1834_p13), %s245_s14, 4096, %s247_s12, %s236_s8, %s3344_s1, %s3343_s9, %s3342_s6  }
  0x64   : > { %258 = sbr.rel (%p1871_p2) target bundleno = 311 (0x137), region = 36 }
  0x69   : > { %s1935_s0 = sand.u32 1, %s1735_s16  }
  0x6a   : > { %s1467_s28 = sshll.u32 %s1935_s0, 3  ;;  %s261_s10 = scalar_lea.sflag [#allocation3], %s1935_s0 }
  0x6b   : > { %s1939_s17 = scalar_lea.vmem [#allocation2], %s1467_s28 }
  0x6c   : > { %1714 = dma.done.wait (%p1813_p6), %s261_s10, 128  }
  0x6d   : > { %1716 = vsyncadd (%p1813_p6), %s261_s10, 4294967168  ;;  %s270_s30 = sand.u32 1, %s1795_s19   ;;  %s1468_s23 = sshll.u32 %s1935_s0, 5 }
  0x6e   : > { %s271_s6 = scalar_lea.sflag [#allocation6], %s270_s30  ;;  %s1947_s9 = scalar_lea.vmem [#allocation5], %s1468_s23 }
  0x6f   : > { %1718 = dma.done.wait (%p1813_p6), %s271_s6, 1024  }
  0x70   : > { %1720 = vsyncadd (%p1813_p6), %s271_s6, 4294966272  ;;  %s1470_s1 = sshll.u32 %s1935_s0, 8  ;;  %s1954_s7 = scalar_lea.vmem [#allocation7], %s1468_s23 }
  0x71   : > { %s291_s22 = scalar_lea.sflag [#allocation9], %s1935_s0  ;;  %s1957_s21 = scalar_lea.vmem [#allocation8], %s1470_s1 }
  0x72   : > { %1722 = dma.done.wait (%p1813_p6), %s291_s22, 4096  }
  0x73   : > { %1724 = vsyncadd (%p1813_p6), %s291_s22, 4294963200  ;;  %v1964_v0 = vld [vmem:[%s1939_s17 + $0x1] sm:$0x1]  ;;  %v3321_v1 = vmov 0.0   ;;  %v339_v3 = vld [vmem:[%s1957_s21] sm:$0x1]  ;;  %s1319_s14 = scalar_lea.hbm %s3311_s4, %s1795_s19 }
  0x74   : > { %3345 = vst [vmem:[#allocation18_spill] sm:$0xff] %v1964_v0  ;;  %vm336_vm0 = vcmp.gt.f32.partialorder %v1964_v0, 0.0  ;;  %vm436_vm1 = vcmp.gt.f32.partialorder %v1964_v0, 1.0  ;;  %v340_v4 = vld [vmem:[%s1957_s21 + $0x8] sm:$0x1]  ;;  %vm536_vm2 = vcmp.gt.f32.partialorder %v1964_v0, 2.0 }
  0x75   : > { %v1471_v2 = vsel %vm336_vm0, 1.0, %v3321_v1  ;;  %v341_v5 = vld [vmem:[%s1957_s21 + $0x10] sm:$0x1]  ;;  %v342_v6 = vld [vmem:[%s1957_s21 + $0x18] sm:$0x1]  ;;  %v1472_v10 = vsel %vm436_vm1, 1.0, %v3321_v1 }
  0x76   : > { %v343_v7 = vld [vmem:[%s1957_s21 + $0x20] sm:$0x1]  ;;  %v344_v8 = vld [vmem:[%s1957_s21 + $0x28] sm:$0x1]  ;;  %v1975_v9 = vperm.slane %v1471_v2, 0  ;;  %v2000_v29 = vperm.slane %v1472_v10, 0 }
  0x77   : > { %v345_v11 = vld [vmem:[%s1957_s21 + $0x30] sm:$0x1]  ;;  %v346_v12 = vld [vmem:[%s1957_s21 + $0x38] sm:$0x1]  ;;  %v347_v13 = vld [vmem:[%s1957_s21 + $0x40] sm:$0x1] }
  0x78   : > { %v348_v14 = vld [vmem:[%s1957_s21 + $0x48] sm:$0x1]  ;;  %v349_v15 = vld [vmem:[%s1957_s21 + $0x50] sm:$0x1]  ;;  %v350_v16 = vld [vmem:[%s1957_s21 + $0x58] sm:$0x1]  ;;  %v1995_v27 = vmul.f32 %v1975_v9, %v339_v3  ;;  %v1998_v28 = vmul.f32 %v1975_v9, %v340_v4  ;;  %v2007_v34 = vmul.f32 %v1975_v9, %v341_v5  ;;  %v2010_v35 = vmul.f32 %v1975_v9, %v342_v6 }
  0x79   : > { %v351_v17 = vld [vmem:[%s1957_s21 + $0x60] sm:$0x1]  ;;  %v352_v18 = vld [vmem:[%s1957_s21 + $0x68] sm:$0x1]  ;;  %v353_v19 = vld [vmem:[%s1957_s21 + $0x70] sm:$0x1]  ;;  %v2013_v36 = vmul.f32 %v1975_v9, %v343_v7  ;;  %v2016_v37 = vmul.f32 %v1975_v9, %v344_v8  ;;  %v2023_v42 = vmul.f32 %v1975_v9, %v345_v11  ;;  %v2026_v43 = vmul.f32 %v1975_v9, %v346_v12 }
  0x7a   : > { %v354_v20 = vld [vmem:[%s1957_s21 + $0x78] sm:$0x1]  ;;  %v355_v21 = vld [vmem:[%s1957_s21 + $0x80] sm:$0x1]  ;;  %v356_v22 = vld [vmem:[%s1957_s21 + $0x88] sm:$0x1]  ;;  %v2029_v44 = vmul.f32 %v1975_v9, %v347_v13  ;;  %v2032_v45 = vmul.f32 %v1975_v9, %v348_v14  ;;  %v2037_v48 = vmul.f32 %v1975_v9, %v349_v15  ;;  %v2040_v49 = vmul.f32 %v1975_v9, %v350_v16 }
  0x7b   : > { %v357_v23 = vld [vmem:[%s1957_s21 + $0x90] sm:$0x1]  ;;  %v358_v24 = vld [vmem:[%s1957_s21 + $0x98] sm:$0x1]  ;;  %v359_v25 = vld [vmem:[%s1957_s21 + $0xa0] sm:$0x1]  ;;  %v2043_v50 = vmul.f32 %v1975_v9, %v351_v17  ;;  %v2046_v51 = vmul.f32 %v1975_v9, %v352_v18  ;;  %v2051_v54 = vmul.f32 %v1975_v9, %v353_v19  ;;  %v2054_v55 = vmul.f32 %v1975_v9, %v354_v20 }
  0x7c   : > { %v360_v26 = vld [vmem:[%s1957_s21 + $0xa8] sm:$0x1]  ;;  %v361_v30 = vld [vmem:[%s1957_s21 + $0xb0] sm:$0x1]  ;;  %v362_v31 = vld [vmem:[%s1957_s21 + $0xb8] sm:$0x1]  ;;  %v2057_v56 = vmul.f32 %v1975_v9, %v355_v21  ;;  %v2060_v57 = vmul.f32 %v1975_v9, %v356_v22  ;;  %v2067_v62 = vmul.f32 %v1975_v9, %v357_v23  ;;  %v2070_v63 = vmul.f32 %v1975_v9, %v358_v24 }
  0x7d   : > { %v363_v32 = vld [vmem:[%s1957_s21 + $0xc0] sm:$0x1]  ;;  %v364_v33 = vld [vmem:[%s1957_s21 + $0xc8] sm:$0x1]  ;;  %v365_v38 = vld [vmem:[%s1957_s21 + $0xd0] sm:$0x1]  ;;  %v2073_v2 = vmul.f32 %v1975_v9, %v359_v25  ;;  %v2076_v3 = vmul.f32 %v1975_v9, %v360_v26  ;;  %v2082_v7 = vmul.f32 %v1975_v9, %v361_v30  ;;  %v2085_v8 = vmul.f32 %v1975_v9, %v362_v31 }
  0x7e   : > { %v366_v39 = vld [vmem:[%s1957_s21 + $0xd8] sm:$0x1]  ;;  %v367_v40 = vld [vmem:[%s1957_s21 + $0xe0] sm:$0x1]  ;;  %v368_v41 = vld [vmem:[%s1957_s21 + $0xe8] sm:$0x1]  ;;  %v2088_v10 = vmul.f32 %v1975_v9, %v363_v32  ;;  %v2091_v11 = vmul.f32 %v1975_v9, %v364_v33  ;;  %v2097_v15 = vmul.f32 %v1975_v9, %v365_v38 }
  0x7f   : > { %v369_v46 = vld [vmem:[%s1957_s21 + $0xf0] sm:$0x1]  ;;  %v370_v47 = vld [vmem:[%s1957_s21 + $0xf8] sm:$0x1]  ;;  %v439_v52 = vld [vmem:[%s1957_s21 + $0x1] sm:$0x1]  ;;  %v2100_v16 = vmul.f32 %v1975_v9, %v366_v39  ;;  %v2103_v17 = vmul.f32 %v1975_v9, %v367_v40  ;;  %v2106_v18 = vmul.f32 %v1975_v9, %v368_v41 }
  0x80   : > { %v440_v53 = vld [vmem:[%s1957_s21 + $0x9] sm:$0x1]  ;;  %v441_v58 = vld [vmem:[%s1957_s21 + $0x11] sm:$0x1]  ;;  %v442_v59 = vld [vmem:[%s1957_s21 + $0x19] sm:$0x1]  ;;  %v2112_v22 = vmul.f32 %v1975_v9, %v369_v46  ;;  %v2115_v23 = vmul.f32 %v1975_v9, %v370_v47  ;;  %v472_v30 = vmul.f32 %v2000_v29, %v439_v52 }
  0x81   : > { %v443_v60 = vld [vmem:[%s1957_s21 + $0x21] sm:$0x1]  ;;  %v444_v61 = vld [vmem:[%s1957_s21 + $0x29] sm:$0x1]  ;;  %3346 = vst [vmem:[#allocation19_spill] sm:$0xff] %v2073_v2  ;;  %v473_v31 = vmul.f32 %v2000_v29, %v440_v53  ;;  %v474_v39 = vmul.f32 %v2000_v29, %v441_v58  ;;  %v475_v40 = vmul.f32 %v2000_v29, %v442_v59  ;;  %vm636_vm3 = vcmp.gt.f32.partialorder %v1964_v0, 3.0 }
  0x82   : > { %3347 = vst [vmem:[#allocation20_spill] sm:$0xff] %v2076_v3  ;;  %v445_v4 = vld [vmem:[%s1957_s21 + $0x31] sm:$0x1]  ;;  %v446_v5 = vld [vmem:[%s1957_s21 + $0x39] sm:$0x1]  ;;  %v476_v9 = vmul.f32 %v2000_v29, %v443_v60  ;;  %v477_v41 = vmul.f32 %v2000_v29, %v444_v61  ;;  %vm1221_vm12 = vcmask 1041409  }
  0x83   : > { %v447_v6 = vld [vmem:[%s1957_s21 + $0x41] sm:$0x1]  ;;  %3348 = vst [vmem:[#allocation21_spill] sm:$0xff] %v2082_v7  ;;  %v448_v12 = vld [vmem:[%s1957_s21 + $0x49] sm:$0x1]  ;;  %v478_v53 = vmul.f32 %v2000_v29, %v445_v4  ;;  %v479_v1 = vmul.f32 %v2000_v29, %v446_v5  ;;  %vm1224_vm13 = vcmask 1042434  }
  0x84   : > { %3349 = vst [vmem:[#allocation22_spill] sm:$0xff] %v2085_v8  ;;  %v449_v13 = vld [vmem:[%s1957_s21 + $0x51] sm:$0x1]  ;;  %v450_v14 = vld [vmem:[%s1957_s21 + $0x59] sm:$0x1]  ;;  %v481_v58 = vmul.f32 %v2000_v29, %v448_v12  ;;  %vm1227_vm14 = vcmask 1043459  }
  0x85   : > { %3350 = vst [vmem:[#allocation23_spill] sm:$0xff] %v2088_v10  ;;  %v451_v19 = vld [vmem:[%s1957_s21 + $0x61] sm:$0x1]  ;;  %v452_v20 = vld [vmem:[%s1957_s21 + $0x69] sm:$0x1]  ;;  %v482_v61 = vmul.f32 %v2000_v29, %v449_v13  ;;  %vm1230_vm15 = vcmask 1044484  }
  0x86   : > { %3351 = vst [vmem:[#allocation24_spill] sm:$0xff] %v2091_v11  ;;  %v453_v21 = vld [vmem:[%s1957_s21 + $0x71] sm:$0x1]  ;;  %v454_v24 = vld [vmem:[%s1957_s21 + $0x79] sm:$0x1]  ;;  %vm1233_vm0 = vcmask 1045509  }
  0x87   : > { %3352 = vst [vmem:[#allocation25_spill] sm:$0xff] %v2097_v15  ;;  %v455_v25 = vld [vmem:[%s1957_s21 + $0x81] sm:$0x1]  ;;  %v456_v26 = vld [vmem:[%s1957_s21 + $0x89] sm:$0x1]  ;;  %v487_v11 = vmul.f32 %v2000_v29, %v454_v24  ;;  %vm1236_vm1 = vcmask 1046534  }
  0x88   : > { %3353 = vst [vmem:[#allocation26_spill] sm:$0xff] %v2100_v16  ;;  %v457_v32 = vld [vmem:[%s1957_s21 + $0x91] sm:$0x1]  ;;  %v458_v33 = vld [vmem:[%s1957_s21 + $0x99] sm:$0x1]  ;;  %v485_v16 = vmul.f32 %v2000_v29, %v452_v20  ;;  %v488_v12 = vmul.f32 %v2000_v29, %v455_v25  ;;  %v489_v10 = vmul.f32 %v2000_v29, %v456_v26  ;;  %s333_s8 = scalar_lea.vmem [#allocation10], %s1935_s0 }
  0x89   : > { %3354 = vst [vmem:[#allocation27_spill] sm:$0xff] %v2103_v17  ;;  %v459_v38 = vld [vmem:[%s1957_s21 + $0xa1] sm:$0x1]  ;;  %v460_v46 = vld [vmem:[%s1957_s21 + $0xa9] sm:$0x1]  ;;  %v484_v17 = vmul.f32 %v2000_v29, %v451_v19  ;;  %v490_v13 = vmul.f32 %v2000_v29, %v457_v32  ;;  %s1321_s24 = sshll.u32 %s333_s8, 4  ;;  %s1322_s24 = int_to_ptr.vmem [resolvable:$true] %s1321_s24 }
  0x8a   : > { %3355 = vst [vmem:[#allocation28_spill] sm:$0xff] %v2106_v18  ;;  %v461_v47 = vld [vmem:[%s1957_s21 + $0xb1] sm:$0x1]  ;;  %v462_v52 = vld [vmem:[%s1957_s21 + $0xb9] sm:$0x1]  ;;  %v483_v18 = vmul.f32 %v2000_v29, %v450_v14  ;;  %v491_v14 = vmul.f32 %v2000_v29, %v458_v33  ;;  %v492_v19 = vmul.f32 %v2000_v29, %v459_v38  ;;  %v493_v20 = vmul.f32 %v2000_v29, %v460_v46  ;;  %s1323_s11 = sshll.u32 %s1319_s14, 4  ;;  %s1324_s11 = int_to_ptr.hbm [resolvable:$true] %s1323_s11 }
  0x8b   : > { %3356 = vst [vmem:[#allocation29_spill] sm:$0xff] %v2112_v22  ;;  %v463_v59 = vld [vmem:[%s1957_s21 + $0xc1] sm:$0x1]  ;;  %v464_v60 = vld [vmem:[%s1957_s21 + $0xc9] sm:$0x1]  ;;  %v494_v3 = vmul.f32 %v2000_v29, %v461_v47  ;;  %v2167_v47 = vadd.f32 %v472_v30, %v1995_v27  ;;  %v2186_v27 = vadd.f32 %v478_v53, %v2023_v42  ;;  %v2206_v42 = vadd.f32 %v484_v17, %v2043_v50  ;;  %v3360_v30 = vld [vmem:[#allocation20_spill] sm:$0xff] }
  0x8c   : > { %3357 = vst [vmem:[#allocation30_spill] sm:$0xff] %v2115_v23  ;;  %v480_v23 = vmul.f32 %v2000_v29, %v447_v6  ;;  %v465_v22 = vld [vmem:[%s1957_s21 + $0xd1] sm:$0x1]  ;;  %v466_v4 = vld [vmem:[%s1957_s21 + $0xd9] sm:$0x1]  ;;  %v486_v6 = vmul.f32 %v2000_v29, %v453_v21  ;;  %v495_v21 = vmul.f32 %v2000_v29, %v462_v52  ;;  %v496_v24 = vmul.f32 %v2000_v29, %v463_v59  ;;  %s1311_s13 = scalar_lea.sflag [#allocation4], %s1935_s0 }
  0x8d   : > { %v467_v15 = vld [vmem:[%s1957_s21 + $0xe1] sm:$0x1]  ;;  %v468_v5 = vld [vmem:[%s1957_s21 + $0xe9] sm:$0x1]  ;;  %v469_v8 = vld [vmem:[%s1957_s21 + $0xf1] sm:$0x1]  ;;  %v497_v25 = vmul.f32 %v2000_v29, %v464_v60  ;;  %v498_v26 = vmul.f32 %v2000_v29, %v465_v22  ;;  %v499_v2 = vmul.f32 %v2000_v29, %v466_v4  ;;  %v2171_v52 = vadd.f32 %v473_v31, %v1998_v28 }
  0x8e   : > { %v470_v7 = vld [vmem:[%s1957_s21 + $0xf9] sm:$0x1]  ;;  %v500_v32 = vmul.f32 %v2000_v29, %v467_v15  ;;  %v501_v33 = vmul.f32 %v2000_v29, %v468_v5  ;;  %v502_v38 = vmul.f32 %v2000_v29, %v469_v8  ;;  %v2174_v22 = vadd.f32 %v474_v39, %v2007_v34  ;;  %v539_v50 = vld [vmem:[%s1957_s21 + $0x2] sm:$0x1]  ;;  %v540_v17 = vld [vmem:[%s1957_s21 + $0xa] sm:$0x1] }
  0x8f   : > { %v503_v46 = vmul.f32 %v2000_v29, %v470_v7  ;;  %v2177_v59 = vadd.f32 %v475_v40, %v2010_v35  ;;  %v2180_v15 = vadd.f32 %v476_v9, %v2013_v36  ;;  %v2183_v8 = vadd.f32 %v477_v41, %v2016_v37  ;;  %v3364_v40 = vld [vmem:[#allocation22_spill] sm:$0xff]  ;;  %v3366_v41 = vld [vmem:[#allocation23_spill] sm:$0xff]  ;;  %v550_v4 = vld [vmem:[%s1957_s21 + $0x5a] sm:$0x1]  ;;  %s1683_s20 = sshra.s32 %s1324_s11, 4  ;;  %s1689_s28 = scalar_lea.hbm %s3311_s4, 2  ;;  %s1684_s20 = int_to_ptr.hbm [resolvable:$true] %s1683_s20 }
  0x90   : > { %v2189_v28 = vadd.f32 %v479_v1, %v2026_v43  ;;  %v2192_v29 = vadd.f32 %v480_v23, %v2029_v44  ;;  %v2195_v34 = vadd.f32 %v481_v58, %v2032_v45  ;;  %v2198_v35 = vadd.f32 %v482_v61, %v2037_v48  ;;  %v547_v58 = vld [vmem:[%s1957_s21 + $0x42] sm:$0x1]  ;;  %v548_v60 = vld [vmem:[%s1957_s21 + $0x4a] sm:$0x1]  ;;  %v549_v61 = vld [vmem:[%s1957_s21 + $0x52] sm:$0x1]  ;;  %p1690_p2 = scmp.lt.s32.totalorder %s1684_s20, %s3311_s4 }
  0x91   : > { %v3358_v36 = vmov 0.0   ;;  %v2203_v1 = vadd.f32 %v483_v18, %v2040_v49  ;;  %v2209_v43 = vadd.f32 %v485_v16, %v2046_v51  ;;  %v2212_v44 = vadd.f32 %v486_v6, %v2051_v54  ;;  %v541_v51 = vld [vmem:[%s1957_s21 + $0x12] sm:$0x1]  ;;  %v542_v54 = vld [vmem:[%s1957_s21 + $0x1a] sm:$0x1]  ;;  %s1685_s5 = scalar_lea.hbm %s1684_s20, 1 }
  0x92   : > { %v1473_v37 = vsel %vm536_vm2, 1.0, %v3358_v36  ;;  %v2215_v45 = vadd.f32 %v487_v11, %v2054_v55  ;;  %v2218_v48 = vadd.f32 %v488_v12, %v2057_v56  ;;  %v2221_v49 = vadd.f32 %v489_v10, %v2060_v57  ;;  %v3359_v11 = vld [vmem:[#allocation19_spill] sm:$0xff]  ;;  %v543_v16 = vld [vmem:[%s1957_s21 + $0x22] sm:$0x1]  ;;  %v545_v10 = vld [vmem:[%s1957_s21 + $0x32] sm:$0x1]  ;;  %p1686_p6 = scmp.ne.s32.totalorder %s1684_s20, %s1685_s5  ;;  %p1691_p3 = scmp.lt.s32.totalorder %s1689_s28, %s1685_s5 }
  0x93   : > { %v2224_v7 = vadd.f32 %v490_v13, %v2067_v62  ;;  %v2231_v55 = vadd.f32 %v491_v14, %v2070_v63  ;;  %v2234_v56 = vadd.f32 %v492_v19, %v3359_v11  ;;  %v544_v57 = vld [vmem:[%s1957_s21 + $0x2a] sm:$0x1]  ;;  %v546_v62 = vld [vmem:[%s1957_s21 + $0x3a] sm:$0x1]  ;;  %v2240_v18 = vperm.slane %v1473_v37, 0  ;;  %v3368_v5 = vld [vmem:[#allocation24_spill] sm:$0xff] }
  0x94   : > { %v1474_v23 = vsel %vm636_vm3, 1.0, %v3358_v36  ;;  %v2246_v31 = vadd.f32 %v493_v20, %v3360_v30  ;;  %v3362_v63 = vld [vmem:[#allocation21_spill] sm:$0xff]  ;;  %v2252_v9 = vadd.f32 %v495_v21, %v3364_v40  ;;  %v2255_v53 = vadd.f32 %v496_v24, %v3366_v41  ;;  %v3372_v13 = vld [vmem:[#allocation26_spill] sm:$0xff]  ;;  %v3374_v19 = vld [vmem:[#allocation27_spill] sm:$0xff]  ;;  %p1687_p13 = pnand %p1686_p6, %p1820_p11  ;;  %p1692_p4 = por %p1691_p3, %p1690_p2 }
  0x95   : > { %v2249_v39 = vadd.f32 %v494_v3, %v3362_v63  ;;  %v2262_v6 = vadd.f32 %v497_v25, %v3368_v5  ;;  %v3370_v3 = vld [vmem:[#allocation25_spill] sm:$0xff]  ;;  %v2268_v14 = vadd.f32 %v499_v2, %v3372_v13  ;;  %v2271_v20 = vadd.f32 %v500_v32, %v3374_v19  ;;  %v551_v21 = vld [vmem:[%s1957_s21 + $0x62] sm:$0x1]  ;;  %v552_v24 = vld [vmem:[%s1957_s21 + $0x6a] sm:$0x1] }
  0x96   : > { %3361 = vst [vmem:[#allocation19_spill] sm:$0xff] %v2246_v31  ;;  %v2265_v12 = vadd.f32 %v498_v26, %v3370_v3  ;;  %v553_v37 = vld [vmem:[%s1957_s21 + $0x72] sm:$0x1]  ;;  %v3378_v25 = vld [vmem:[#allocation29_spill] sm:$0xff]  ;;  %v3380_v26 = vld [vmem:[#allocation30_spill] sm:$0xff]  ;;  %v2287_v32 = vperm.slane %v1474_v23, 0  ;;  %v572_v19 = vmul.f32 %v2240_v18, %v539_v50  ;;  %v577_v36 = vmul.f32 %v2240_v18, %v544_v57  ;;  %p1688_p1 = pneg %p1687_p13 }
  0x97   : > { %3363 = vst [vmem:[#allocation20_spill] sm:$0xff] %v2249_v39  ;;  %v3376_v11 = vld [vmem:[#allocation28_spill] sm:$0xff]  ;;  %v2280_v63 = vadd.f32 %v502_v38, %v3378_v25  ;;  %v2283_v40 = vadd.f32 %v503_v46, %v3380_v26  ;;  %v554_v2 = vld [vmem:[%s1957_s21 + $0x7a] sm:$0x1]  ;;  %v555_v41 = vld [vmem:[%s1957_s21 + $0x82] sm:$0x1]  ;;  %v574_v38 = vmul.f32 %v2240_v18, %v541_v51  ;;  %v575_v46 = vmul.f32 %v2240_v18, %v542_v54 }
  0x98   : > { %3365 = vst [vmem:[#allocation21_spill] sm:$0xff] %v2252_v9  ;;  %v2277_v30 = vadd.f32 %v501_v33, %v3376_v11  ;;  %v556_v5 = vld [vmem:[%s1957_s21 + $0x8a] sm:$0x1]  ;;  %v557_v3 = vld [vmem:[%s1957_s21 + $0x92] sm:$0x1]  ;;  %v573_v33 = vmul.f32 %v2240_v18, %v540_v17  ;;  %v576_v26 = vmul.f32 %v2240_v18, %v543_v16  ;;  %v578_v0 = vmul.f32 %v2240_v18, %v545_v10  ;;  %p1693_p5 = pnand %p1692_p4, %p1688_p1 }
  0x99   : > { %3367 = vst [vmem:[#allocation22_spill] sm:$0xff] %v2255_v53  ;;  %v558_v13 = vld [vmem:[%s1957_s21 + $0x9a] sm:$0x1]  ;;  %v559_v11 = vld [vmem:[%s1957_s21 + $0xa2] sm:$0x1]  ;;  %v579_v50 = vmul.f32 %v2240_v18, %v546_v62  ;;  %v580_v54 = vmul.f32 %v2240_v18, %v547_v58  ;;  %v583_v16 = vmul.f32 %v2240_v18, %v550_v4  ;;  %v584_v10 = vmul.f32 %v2240_v18, %v551_v21 }
  0x9a   : > { %3369 = vst [vmem:[#allocation23_spill] sm:$0xff] %v2262_v6  ;;  %v560_v25 = vld [vmem:[%s1957_s21 + $0xaa] sm:$0x1]  ;;  %v561_v23 = vld [vmem:[%s1957_s21 + $0xb2] sm:$0x1]  ;;  %v585_v62 = vmul.f32 %v2240_v18, %v552_v24  ;;  %v590_v4 = vmul.f32 %v2240_v18, %v557_v3  ;;  %v591_v9 = vmul.f32 %v2240_v18, %v558_v13  ;;  %v592_v39 = vmul.f32 %v2240_v18, %v559_v11 }
  0x9b   : > { %3371 = vst [vmem:[#allocation24_spill] sm:$0xff] %v2265_v12  ;;  %v562_v17 = vld [vmem:[%s1957_s21 + $0xba] sm:$0x1]  ;;  %v563_v51 = vld [vmem:[%s1957_s21 + $0xc2] sm:$0x1]  ;;  %v587_v12 = vmul.f32 %v2240_v18, %v554_v2  ;;  %v593_v21 = vmul.f32 %v2240_v18, %v560_v25  ;;  %v594_v24 = vmul.f32 %v2240_v18, %v561_v23  ;;  %v2337_v23 = vadd.f32 %v572_v19, %v2167_v47 }
  0x9c   : > { %3373 = vst [vmem:[#allocation25_spill] sm:$0xff] %v2268_v14  ;;  %v566_v57 = vld [vmem:[%s1957_s21 + $0xda] sm:$0x1]  ;;  %v586_v14 = vmul.f32 %v2240_v18, %v553_v37  ;;  %v568_v6 = vld [vmem:[%s1957_s21 + $0xea] sm:$0x1]  ;;  %v595_v37 = vmul.f32 %v2240_v18, %v562_v17  ;;  %v596_v2 = vmul.f32 %v2240_v18, %v563_v51  ;;  %v2340_v17 = vadd.f32 %v573_v33, %v2171_v52 }
  0x9d   : > { %3375 = vst [vmem:[#allocation26_spill] sm:$0xff] %v2271_v20  ;;  %v567_v20 = vld [vmem:[%s1957_s21 + $0xe2] sm:$0x1]  ;;  %v569_v53 = vld [vmem:[%s1957_s21 + $0xf2] sm:$0x1]  ;;  %v601_v13 = vmul.f32 %v2240_v18, %v568_v6  ;;  %v2355_v47 = vadd.f32 %v578_v0, %v2186_v27  ;;  %v2358_v52 = vadd.f32 %v579_v50, %v2189_v28  ;;  %v2373_v0 = vadd.f32 %v584_v10, %v2206_v42 }
  0x9e   : > { %3377 = vst [vmem:[#allocation27_spill] sm:$0xff] %v2277_v30  ;;  %v565_v30 = vld [vmem:[%s1957_s21 + $0xd2] sm:$0x1]  ;;  %v570_v58 = vld [vmem:[%s1957_s21 + $0xfa] sm:$0x1]  ;;  %v600_v3 = vmul.f32 %v2240_v18, %v567_v20  ;;  %v602_v11 = vmul.f32 %v2240_v18, %v569_v53  ;;  %v2346_v20 = vadd.f32 %v575_v46, %v2177_v59  ;;  %v2349_v53 = vadd.f32 %v576_v26, %v2180_v15 }
  0x9f   : > { %3379 = vst [vmem:[#allocation28_spill] sm:$0xff] %v2280_v63  ;;  %v582_v63 = vmul.f32 %v2240_v18, %v549_v61  ;;  %v589_v61 = vmul.f32 %v2240_v18, %v556_v5  ;;  %v599_v5 = vmul.f32 %v2240_v18, %v566_v57  ;;  %v603_v25 = vmul.f32 %v2240_v18, %v570_v58  ;;  %v648_v33 = vld [vmem:[%s1957_s21 + $0x4b] sm:$0x1]  ;;  %v650_v57 = vld [vmem:[%s1957_s21 + $0x5b] sm:$0x1] }
  0xa0   : > { %3381 = vst [vmem:[#allocation29_spill] sm:$0xff] %v2283_v40  ;;  %v581_v40 = vmul.f32 %v2240_v18, %v548_v60  ;;  %v588_v60 = vmul.f32 %v2240_v18, %v555_v41  ;;  %v598_v41 = vmul.f32 %v2240_v18, %v565_v30  ;;  %v2343_v30 = vadd.f32 %v574_v38, %v2174_v22  ;;  %v649_v38 = vld [vmem:[%s1957_s21 + $0x53] sm:$0x1]  ;;  %v3389_v46 = vld [vmem:[#allocation22_spill] sm:$0xff] }
  0xa1   : > { %3382 = vst [vmem:[#allocation30_spill] sm:$0xff] %v2287_v32  ;;  %v564_v32 = vld [vmem:[%s1957_s21 + $0xca] sm:$0x1]  ;;  %v2361_v22 = vadd.f32 %v580_v54, %v2192_v29  ;;  %v2367_v15 = vadd.f32 %v582_v63, %v2198_v35  ;;  %v2376_v27 = vadd.f32 %v585_v62, %v2209_v43  ;;  %v2379_v28 = vadd.f32 %v586_v14, %v2212_v44  ;;  %v640_v35 = vld [vmem:[%s1957_s21 + $0xb] sm:$0x1] }
  0xa2   : > { %v597_v31 = vmul.f32 %v2240_v18, %v564_v32  ;;  %v2352_v18 = vadd.f32 %v577_v36, %v2183_v8  ;;  %v2364_v59 = vadd.f32 %v581_v40, %v2195_v34  ;;  %v2370_v8 = vadd.f32 %v583_v16, %v2203_v1  ;;  %v639_v34 = vld [vmem:[%s1957_s21 + $0x3] sm:$0x1]  ;;  %v641_v36 = vld [vmem:[%s1957_s21 + $0x13] sm:$0x1]  ;;  %v642_v1 = vld [vmem:[%s1957_s21 + $0x1b] sm:$0x1] }
  0xa3   : > { %v2382_v29 = vadd.f32 %v587_v12, %v2215_v45  ;;  %v2389_v6 = vadd.f32 %v588_v60, %v2218_v48  ;;  %v2392_v42 = vadd.f32 %v589_v61, %v2221_v49  ;;  %v2395_v43 = vadd.f32 %v590_v4, %v2224_v7  ;;  %v643_v45 = vld [vmem:[%s1957_s21 + $0x23] sm:$0x1]  ;;  %v644_v12 = vld [vmem:[%s1957_s21 + $0x2b] sm:$0x1]  ;;  %v645_v14 = vld [vmem:[%s1957_s21 + $0x33] sm:$0x1] }
  0xa4   : > { %v2398_v44 = vadd.f32 %v591_v9, %v2231_v55  ;;  %v646_v63 = vld [vmem:[%s1957_s21 + $0x3b] sm:$0x1]  ;;  %v2405_v40 = vadd.f32 %v592_v39, %v2234_v56  ;;  %v3383_v48 = vld [vmem:[#allocation19_spill] sm:$0xff]  ;;  %v3385_v49 = vld [vmem:[#allocation20_spill] sm:$0xff]  ;;  %v2420_v56 = vadd.f32 %v596_v2, %v3389_v46  ;;  %vm1239_vm2 = vcmask 1047559  }
  0xa5   : > { %v2408_v32 = vadd.f32 %v593_v21, %v3383_v48  ;;  %v2411_v19 = vadd.f32 %v594_v24, %v3385_v49  ;;  %v3387_v7 = vld [vmem:[#allocation21_spill] sm:$0xff]  ;;  %v647_v9 = vld [vmem:[%s1957_s21 + $0x43] sm:$0x1]  ;;  %v3391_v39 = vld [vmem:[#allocation23_spill] sm:$0xff] }
  0xa6   : > { %v2414_v55 = vadd.f32 %v595_v37, %v3387_v7  ;;  %3390 = vst [vmem:[#allocation22_spill] sm:$0xff] %v2420_v56  ;;  %v2423_v26 = vadd.f32 %v597_v31, %v3391_v39  ;;  %v3393_v50 = vld [vmem:[#allocation24_spill] sm:$0xff]  ;;  %v3395_v54 = vld [vmem:[#allocation25_spill] sm:$0xff]  ;;  %v651_v10 = vld [vmem:[%s1957_s21 + $0x63] sm:$0x1] }
  0xa7   : > { %3384 = vst [vmem:[#allocation19_spill] sm:$0xff] %v2408_v32  ;;  %v2426_v51 = vadd.f32 %v598_v41, %v3393_v50  ;;  %v2429_v16 = vadd.f32 %v599_v5, %v3395_v54  ;;  %v652_v62 = vld [vmem:[%s1957_s21 + $0x6b] sm:$0x1]  ;;  %v3397_v58 = vld [vmem:[#allocation26_spill] sm:$0xff]  ;;  %v3401_v31 = vld [vmem:[#allocation28_spill] sm:$0xff] }
  0xa8   : > { %3386 = vst [vmem:[#allocation20_spill] sm:$0xff] %v2411_v19  ;;  %v2435_v60 = vadd.f32 %v600_v3, %v3397_v58  ;;  %v3399_v61 = vld [vmem:[#allocation27_spill] sm:$0xff]  ;;  %v2441_v21 = vadd.f32 %v602_v11, %v3401_v31  ;;  %v3403_v24 = vld [vmem:[#allocation29_spill] sm:$0xff]  ;;  %v653_v2 = vld [vmem:[%s1957_s21 + $0x73] sm:$0x1] }
  0xa9   : > { %3388 = vst [vmem:[#allocation21_spill] sm:$0xff] %v2414_v55  ;;  %v2438_v4 = vadd.f32 %v601_v13, %v3399_v61  ;;  %v2444_v37 = vadd.f32 %v603_v25, %v3403_v24  ;;  %v654_v41 = vld [vmem:[%s1957_s21 + $0x7b] sm:$0x1]  ;;  %v655_v5 = vld [vmem:[%s1957_s21 + $0x83] sm:$0x1] }
  0xaa   : > { %3392 = vst [vmem:[#allocation23_spill] sm:$0xff] %v2423_v26  ;;  %v656_v48 = vld [vmem:[%s1957_s21 + $0x8b] sm:$0x1]  ;;  %v657_v49 = vld [vmem:[%s1957_s21 + $0x93] sm:$0x1]  ;;  %v3405_v7 = vld [vmem:[#allocation30_spill] sm:$0xff] }
  0xab   : > { %3394 = vst [vmem:[#allocation24_spill] sm:$0xff] %v2426_v51  ;;  %v658_v3 = vld [vmem:[%s1957_s21 + $0x9b] sm:$0x1]  ;;  %v672_v46 = vmul.f32 %v3405_v7, %v639_v34  ;;  %v673_v13 = vmul.f32 %v3405_v7, %v640_v35  ;;  %v674_v39 = vmul.f32 %v3405_v7, %v641_v36  ;;  %v675_v11 = vmul.f32 %v3405_v7, %v642_v1  ;;  %v659_v25 = vld [vmem:[%s1957_s21 + $0xa3] sm:$0x1] }
  0xac   : > { %3396 = vst [vmem:[#allocation25_spill] sm:$0xff] %v2429_v16  ;;  %v660_v50 = vld [vmem:[%s1957_s21 + $0xab] sm:$0x1]  ;;  %v661_v54 = vld [vmem:[%s1957_s21 + $0xb3] sm:$0x1]  ;;  %v676_v58 = vmul.f32 %v3405_v7, %v643_v45  ;;  %v677_v61 = vmul.f32 %v3405_v7, %v644_v12  ;;  %v678_v31 = vmul.f32 %v3405_v7, %v645_v14  ;;  %v679_v34 = vmul.f32 %v3405_v7, %v646_v63 }
  0xad   : > { %3398 = vst [vmem:[#allocation26_spill] sm:$0xff] %v2435_v60  ;;  %v662_v35 = vld [vmem:[%s1957_s21 + $0xbb] sm:$0x1]  ;;  %v663_v36 = vld [vmem:[%s1957_s21 + $0xc3] sm:$0x1]  ;;  %v680_v1 = vmul.f32 %v3405_v7, %v647_v9  ;;  %v683_v45 = vmul.f32 %v3405_v7, %v650_v57  ;;  %v684_v14 = vmul.f32 %v3405_v7, %v651_v10  ;;  %v685_v63 = vmul.f32 %v3405_v7, %v652_v62 }
  0xae   : > { %3400 = vst [vmem:[#allocation27_spill] sm:$0xff] %v2438_v4  ;;  %v664_v24 = vld [vmem:[%s1957_s21 + $0xcb] sm:$0x1]  ;;  %v665_v4 = vld [vmem:[%s1957_s21 + $0xd3] sm:$0x1]  ;;  %v686_v16 = vmul.f32 %v3405_v7, %v653_v2  ;;  %v687_v51 = vmul.f32 %v3405_v7, %v654_v41  ;;  %v690_v57 = vmul.f32 %v3405_v7, %v657_v49  ;;  %v691_v55 = vmul.f32 %v3405_v7, %v658_v3 }
  0xaf   : > { %3402 = vst [vmem:[#allocation28_spill] sm:$0xff] %v2441_v21  ;;  %v682_v21 = vmul.f32 %v3405_v7, %v649_v38  ;;  %v666_v12 = vld [vmem:[%s1957_s21 + $0xdb] sm:$0x1]  ;;  %v667_v60 = vld [vmem:[%s1957_s21 + $0xe3] sm:$0x1]  ;;  %v689_v38 = vmul.f32 %v3405_v7, %v656_v48  ;;  %v692_v19 = vmul.f32 %v3405_v7, %v659_v25  ;;  %v693_v10 = vmul.f32 %v3405_v7, %v660_v50 }
  0xb0   : > { %3404 = vst [vmem:[#allocation29_spill] sm:$0xff] %v2444_v37  ;;  %v681_v37 = vmul.f32 %v3405_v7, %v648_v33  ;;  %v668_v26 = vld [vmem:[%s1957_s21 + $0xeb] sm:$0x1]  ;;  %v669_v56 = vld [vmem:[%s1957_s21 + $0xf3] sm:$0x1]  ;;  %v688_v33 = vmul.f32 %v3405_v7, %v655_v5  ;;  %v694_v62 = vmul.f32 %v3405_v7, %v661_v54  ;;  %v695_v2 = vmul.f32 %v3405_v7, %v662_v35 }
  0xb1   : > { %v670_v9 = vld [vmem:[%s1957_s21 + $0xfb] sm:$0x1]  ;;  %v696_v41 = vmul.f32 %v3405_v7, %v663_v36  ;;  %v697_v32 = vmul.f32 %v3405_v7, %v664_v24  ;;  %v698_v5 = vmul.f32 %v3405_v7, %v665_v4  ;;  %v699_v48 = vmul.f32 %v3405_v7, %v666_v12  ;;  %v3406_v4 = vld [vmem:[#allocation18_spill] sm:$0xff]  ;;  %v749_v12 = vld [vmem:[%s1957_s21 + $0x54] sm:$0x1] }
  0xb2   : > { %v700_v49 = vmul.f32 %v3405_v7, %v667_v60  ;;  %v701_v3 = vmul.f32 %v3405_v7, %v668_v26  ;;  %v702_v25 = vmul.f32 %v3405_v7, %v669_v56  ;;  %v703_v50 = vmul.f32 %v3405_v7, %v670_v9  ;;  %v743_v7 = vld [vmem:[%s1957_s21 + $0x24] sm:$0x1] }
  0xb3   : > { %v2497_v54 = vadd.f32 %v672_v46, %v2337_v23  ;;  %v2500_v35 = vadd.f32 %v673_v13, %v2340_v17  ;;  %v2503_v36 = vadd.f32 %v674_v39, %v2343_v30  ;;  %vm736_vm4 = vcmp.gt.f32.partialorder %v3406_v4, 4.0  ;;  %v745_v46 = vld [vmem:[%s1957_s21 + $0x34] sm:$0x1]  ;;  %v746_v13 = vld [vmem:[%s1957_s21 + $0x3c] sm:$0x1] }
  0xb4   : > { %v2507_v24 = vadd.f32 %v675_v11, %v2346_v20  ;;  %v2510_v26 = vadd.f32 %v676_v58, %v2349_v53  ;;  %v2513_v56 = vadd.f32 %v677_v61, %v2352_v18  ;;  %v2516_v23 = vadd.f32 %v678_v31, %v2355_v47  ;;  %v3412_v39 = vld [vmem:[#allocation21_spill] sm:$0xff]  ;;  %v3414_v58 = vld [vmem:[#allocation22_spill] sm:$0xff]  ;;  %v3416_v31 = vld [vmem:[#allocation23_spill] sm:$0xff] }
  0xb5   : > { %v2519_v17 = vadd.f32 %v679_v34, %v2358_v52  ;;  %v2522_v30 = vadd.f32 %v680_v1, %v2361_v22  ;;  %v2525_v20 = vadd.f32 %v681_v37, %v2364_v59  ;;  %v2528_v53 = vadd.f32 %v682_v21, %v2367_v15  ;;  %v747_v1 = vld [vmem:[%s1957_s21 + $0x44] sm:$0x1] }
  0xb6   : > { %v2531_v18 = vadd.f32 %v683_v45, %v2370_v8  ;;  %v2534_v47 = vadd.f32 %v684_v14, %v2373_v0  ;;  %v3407_v52 = vmov 0.0   ;;  %vm836_vm5 = vcmp.gt.f32.partialorder %v3406_v4, 5.0  ;;  %v748_v45 = vld [vmem:[%s1957_s21 + $0x4c] sm:$0x1]  ;;  %v750_v14 = vld [vmem:[%s1957_s21 + $0x5c] sm:$0x1] }
  0xb7   : > { %v1475_v60 = vsel %vm736_vm4, 1.0, %v3407_v52  ;;  %v2539_v22 = vadd.f32 %v685_v63, %v2376_v27  ;;  %v2542_v59 = vadd.f32 %v686_v16, %v2379_v28  ;;  %v2545_v15 = vadd.f32 %v687_v51, %v2382_v29  ;;  %v739_v28 = vld [vmem:[%s1957_s21 + $0x4] sm:$0x1]  ;;  %v740_v16 = vld [vmem:[%s1957_s21 + $0xc] sm:$0x1]  ;;  %v3418_v63 = vld [vmem:[#allocation24_spill] sm:$0xff] }
  0xb8   : > { %v2548_v8 = vadd.f32 %v688_v33, %v2389_v6  ;;  %v2551_v0 = vadd.f32 %v689_v38, %v2392_v42  ;;  %v2554_v21 = vadd.f32 %v690_v57, %v2395_v43  ;;  %v2557_v37 = vadd.f32 %v691_v55, %v2398_v44  ;;  %v741_v29 = vld [vmem:[%s1957_s21 + $0x14] sm:$0x1]  ;;  %v742_v6 = vld [vmem:[%s1957_s21 + $0x1c] sm:$0x1]  ;;  %v3408_v51 = vld [vmem:[#allocation19_spill] sm:$0xff] }
  0xb9   : > { %v2560_v27 = vadd.f32 %v692_v19, %v2405_v40  ;;  %v2567_v42 = vadd.f32 %v693_v10, %v3408_v51  ;;  %v744_v43 = vld [vmem:[%s1957_s21 + $0x2c] sm:$0x1]  ;;  %v2573_v44 = vperm.slane %v1475_v60, 0  ;;  %v1476_v40 = vsel %vm836_vm5, 1.0, %v3407_v52  ;;  %v3410_v19 = vld [vmem:[#allocation20_spill] sm:$0xff]  ;;  %v3420_v33 = vld [vmem:[#allocation25_spill] sm:$0xff] }
  0xba   : > { %vm936_vm6 = vcmp.gt.f32.partialorder %v3406_v4, 6.0  ;;  %v2580_v55 = vadd.f32 %v694_v62, %v3410_v19  ;;  %v2583_v11 = vadd.f32 %v695_v2, %v3412_v39  ;;  %v2586_v61 = vadd.f32 %v696_v41, %v3414_v58  ;;  %v3422_v57 = vld [vmem:[#allocation26_spill] sm:$0xff]  ;;  %v3424_v62 = vld [vmem:[#allocation27_spill] sm:$0xff]  ;;  %v753_v60 = vld [vmem:[%s1957_s21 + $0x74] sm:$0x1] }
  0xbb   : > { %3409 = vst [vmem:[#allocation30_spill] sm:$0xff] %v2567_v42  ;;  %v2589_v34 = vadd.f32 %v697_v32, %v3416_v31  ;;  %v2596_v9 = vadd.f32 %v698_v5, %v3418_v63  ;;  %v2599_v38 = vadd.f32 %v699_v48, %v3420_v33  ;;  %v2602_v10 = vadd.f32 %v700_v49, %v3422_v57  ;;  %v751_v32 = vld [vmem:[%s1957_s21 + $0x64] sm:$0x1]  ;;  %v752_v41 = vld [vmem:[%s1957_s21 + $0x6c] sm:$0x1]  ;;  %v3426_v51 = vld [vmem:[#allocation28_spill] sm:$0xff] }
  0xbc   : > { %3411 = vst [vmem:[#allocation18_spill] sm:$0xff] %v2580_v55  ;;  %v2605_v2 = vadd.f32 %v701_v3, %v3424_v62  ;;  %v2611_v19 = vadd.f32 %v702_v25, %v3426_v51  ;;  %v3428_v5 = vld [vmem:[#allocation29_spill] sm:$0xff]  ;;  %v755_v58 = vld [vmem:[%s1957_s21 + $0x84] sm:$0x1]  ;;  %v2618_v31 = vperm.slane %v1476_v40, 0  ;;  %v2623_v49 = vsel %vm936_vm6, 1.0, %v3407_v52 }
  0xbd   : > { %3413 = vst [vmem:[#allocation19_spill] sm:$0xff] %v2583_v11  ;;  %v2614_v39 = vadd.f32 %v703_v50, %v3428_v5  ;;  %v754_v48 = vld [vmem:[%s1957_s21 + $0x7c] sm:$0x1]  ;;  %v756_v3 = vld [vmem:[%s1957_s21 + $0x8c] sm:$0x1]  ;;  %v772_v25 = vmul.f32 %v2573_v44, %v739_v28  ;;  %v773_v50 = vmul.f32 %v2573_v44, %v740_v16  ;;  %v774_v57 = vmul.f32 %v2573_v44, %v741_v29 }
  0xbe   : > { %3415 = vst [vmem:[#allocation20_spill] sm:$0xff] %v2586_v61  ;;  %v757_v63 = vld [vmem:[%s1957_s21 + $0x94] sm:$0x1]  ;;  %v758_v33 = vld [vmem:[%s1957_s21 + $0x9c] sm:$0x1]  ;;  %v775_v40 = vmul.f32 %v2573_v44, %v742_v6  ;;  %v776_v5 = vmul.f32 %v2573_v44, %v743_v7  ;;  %v777_v52 = vmul.f32 %v2573_v44, %v744_v43  ;;  %v779_v28 = vmul.f32 %v2573_v44, %v746_v13 }
  0xbf   : > { %3417 = vst [vmem:[#allocation21_spill] sm:$0xff] %v2589_v34  ;;  %v759_v62 = vld [vmem:[%s1957_s21 + $0xa4] sm:$0x1]  ;;  %v760_v4 = vld [vmem:[%s1957_s21 + $0xac] sm:$0x1]  ;;  %v780_v6 = vmul.f32 %v2573_v44, %v747_v1  ;;  %v783_v7 = vmul.f32 %v2573_v44, %v750_v14  ;;  %v785_v13 = vmul.f32 %v2573_v44, %v752_v41  ;;  %v790_v14 = vmul.f32 %v2573_v44, %v757_v63 }
  0xc0   : > { %3419 = vst [vmem:[#allocation22_spill] sm:$0xff] %v2596_v9  ;;  %v761_v51 = vld [vmem:[%s1957_s21 + $0xb4] sm:$0x1]  ;;  %v762_v16 = vld [vmem:[%s1957_s21 + $0xbc] sm:$0x1]  ;;  %v787_v9 = vmul.f32 %v2573_v44, %v754_v48  ;;  %v791_v11 = vmul.f32 %v2573_v44, %v758_v33  ;;  %v792_v55 = vmul.f32 %v2573_v44, %v759_v62 }
  0xc1   : > { %3421 = vst [vmem:[#allocation23_spill] sm:$0xff] %v2599_v38  ;;  %v763_v29 = vld [vmem:[%s1957_s21 + $0xc4] sm:$0x1]  ;;  %v766_v43 = vld [vmem:[%s1957_s21 + $0xdc] sm:$0x1]  ;;  %v786_v38 = vmul.f32 %v2573_v44, %v753_v60  ;;  %v794_v41 = vmul.f32 %v2573_v44, %v761_v51  ;;  %v795_v60 = vmul.f32 %v2573_v44, %v762_v16  ;;  %v2673_v51 = vadd.f32 %v772_v25, %v2497_v54 }
  0xc2   : > { %3423 = vst [vmem:[#allocation24_spill] sm:$0xff] %v2602_v10  ;;  %v767_v10 = vld [vmem:[%s1957_s21 + $0xe4] sm:$0x1]  ;;  %v768_v34 = vld [vmem:[%s1957_s21 + $0xec] sm:$0x1]  ;;  %v796_v48 = vmul.f32 %v2573_v44, %v763_v29  ;;  %v2676_v16 = vadd.f32 %v773_v50, %v2500_v35  ;;  %v2694_v35 = vadd.f32 %v779_v28, %v2519_v17  ;;  %v2712_v17 = vadd.f32 %v785_v13, %v2539_v22 }
  0xc3   : > { %3425 = vst [vmem:[#allocation25_spill] sm:$0xff] %v2605_v2  ;;  %v765_v2 = vld [vmem:[%s1957_s21 + $0xd4] sm:$0x1]  ;;  %v770_v1 = vld [vmem:[%s1957_s21 + $0xfc] sm:$0x1]  ;;  %v800_v63 = vmul.f32 %v2573_v44, %v767_v10  ;;  %v801_v33 = vmul.f32 %v2573_v44, %v768_v34  ;;  %v2685_v34 = vadd.f32 %v776_v5, %v2510_v26  ;;  %v2729_v22 = vadd.f32 %v790_v14, %v2554_v21 }
  0xc4   : > { %3427 = vst [vmem:[#allocation26_spill] sm:$0xff] %v2611_v19  ;;  %v782_v19 = vmul.f32 %v2573_v44, %v749_v12  ;;  %v769_v61 = vld [vmem:[%s1957_s21 + $0xf4] sm:$0x1]  ;;  %v789_v12 = vmul.f32 %v2573_v44, %v756_v3  ;;  %v799_v3 = vmul.f32 %v2573_v44, %v766_v43  ;;  %v3436_v21 = vld [vmem:[#allocation19_spill] sm:$0xff]  ;;  %v849_v25 = vld [vmem:[%s1957_s21 + $0x55] sm:$0x1] }
  0xc5   : > { %3429 = vst [vmem:[#allocation27_spill] sm:$0xff] %v2614_v39  ;;  %v781_v39 = vmul.f32 %v2573_v44, %v748_v45  ;;  %v788_v45 = vmul.f32 %v2573_v44, %v755_v58  ;;  %v798_v58 = vmul.f32 %v2573_v44, %v765_v2  ;;  %v802_v62 = vmul.f32 %v2573_v44, %v769_v61  ;;  %v850_v50 = vld [vmem:[%s1957_s21 + $0x5d] sm:$0x1]  ;;  %v852_v13 = vld [vmem:[%s1957_s21 + $0x6d] sm:$0x1] }
  0xc6   : > { %3430 = vst [vmem:[#allocation28_spill] sm:$0xff] %v2618_v31  ;;  %v764_v31 = vld [vmem:[%s1957_s21 + $0xcc] sm:$0x1]  ;;  %v2679_v2 = vadd.f32 %v774_v57, %v2503_v36  ;;  %v2688_v61 = vadd.f32 %v777_v52, %v2513_v56  ;;  %v2697_v36 = vadd.f32 %v780_v6, %v2522_v30  ;;  %v2703_v26 = vadd.f32 %v782_v19, %v2528_v53  ;;  %v840_v53 = vld [vmem:[%s1957_s21 + $0xd] sm:$0x1]  ;;  %v3440_v57 = vld [vmem:[#allocation21_spill] sm:$0xff] }
  0xc7   : > { %3431 = vst [vmem:[#allocation29_spill] sm:$0xff] %v2623_v49  ;;  %v778_v49 = vmul.f32 %v2573_v44, %v745_v46  ;;  %v784_v46 = vmul.f32 %v2573_v44, %v751_v32  ;;  %v793_v32 = vmul.f32 %v2573_v44, %v760_v4  ;;  %v797_v42 = vmul.f32 %v2573_v44, %v764_v31  ;;  %v841_v52 = vld [vmem:[%s1957_s21 + $0x15] sm:$0x1]  ;;  %v3442_v5 = vld [vmem:[#allocation22_spill] sm:$0xff]  ;;  %v846_v43 = vld [vmem:[%s1957_s21 + $0x3d] sm:$0x1] }
  0xc8   : > { %v803_v4 = vmul.f32 %v2573_v44, %v770_v1  ;;  %v2682_v31 = vadd.f32 %v775_v40, %v2507_v24  ;;  %v2700_v24 = vadd.f32 %v781_v39, %v2525_v20  ;;  %v2706_v56 = vadd.f32 %v783_v7, %v2531_v18  ;;  %v839_v44 = vld [vmem:[%s1957_s21 + $0x5] sm:$0x1]  ;;  %v3444_v29 = vld [vmem:[#allocation23_spill] sm:$0xff]  ;;  %v845_v7 = vld [vmem:[%s1957_s21 + $0x35] sm:$0x1] }
  0xc9   : > { %v2691_v54 = vadd.f32 %v778_v49, %v2516_v23  ;;  %v2709_v23 = vadd.f32 %v784_v46, %v2534_v47  ;;  %v2715_v30 = vadd.f32 %v786_v38, %v2542_v59  ;;  %v2718_v20 = vadd.f32 %v787_v9, %v2545_v15  ;;  %v842_v15 = vld [vmem:[%s1957_s21 + $0x1d] sm:$0x1]  ;;  %v843_v9 = vld [vmem:[%s1957_s21 + $0x25] sm:$0x1]  ;;  %v848_v49 = vld [vmem:[%s1957_s21 + $0x4d] sm:$0x1] }
  0xca   : > { %v2723_v18 = vadd.f32 %v788_v45, %v2548_v8  ;;  %v2726_v47 = vadd.f32 %v789_v12, %v2551_v0  ;;  %v2732_v59 = vadd.f32 %v791_v11, %v2557_v37  ;;  %v2738_v38 = vadd.f32 %v792_v55, %v2560_v27  ;;  %v3432_v8 = vld [vmem:[#allocation30_spill] sm:$0xff]  ;;  %v844_v37 = vld [vmem:[%s1957_s21 + $0x2d] sm:$0x1]  ;;  %v3438_v27 = vld [vmem:[#allocation20_spill] sm:$0xff] }
  0xcb   : > { %v2741_v10 = vadd.f32 %v793_v32, %v3432_v8  ;;  %v3434_v0 = vld [vmem:[#allocation18_spill] sm:$0xff]  ;;  %v2747_v39 = vadd.f32 %v795_v60, %v3436_v21  ;;  %v2755_v55 = vadd.f32 %v796_v48, %v3438_v27  ;;  %v2758_v40 = vadd.f32 %v797_v42, %v3440_v57  ;;  %v3446_v1 = vld [vmem:[#allocation24_spill] sm:$0xff]  ;;  %v3448_v12 = vld [vmem:[#allocation25_spill] sm:$0xff] }
  0xcc   : > { %v2744_v19 = vadd.f32 %v794_v41, %v3434_v0  ;;  %v847_v11 = vld [vmem:[%s1957_s21 + $0x45] sm:$0x1]  ;;  %v2761_v28 = vadd.f32 %v798_v58, %v3442_v5  ;;  %v2764_v6 = vadd.f32 %v799_v3, %v3444_v29  ;;  %v2771_v45 = vadd.f32 %v800_v63, %v3446_v1  ;;  %v3452_v41 = vld [vmem:[#allocation27_spill] sm:$0xff]  ;;  %v853_v48 = vld [vmem:[%s1957_s21 + $0x75] sm:$0x1] }
  0xcd   : > { %3433 = vst [vmem:[#allocation30_spill] sm:$0xff] %v2741_v10  ;;  %v851_v46 = vld [vmem:[%s1957_s21 + $0x65] sm:$0x1]  ;;  %v2774_v42 = vadd.f32 %v801_v33, %v3448_v12  ;;  %v2780_v60 = vadd.f32 %v803_v4, %v3452_v41  ;;  %v854_v58 = vld [vmem:[%s1957_s21 + $0x7d] sm:$0x1]  ;;  %v3454_v21 = vld [vmem:[#allocation28_spill] sm:$0xff] }
  0xce   : > { %3435 = vst [vmem:[#allocation18_spill] sm:$0xff] %v2744_v19  ;;  %v3450_v14 = vld [vmem:[#allocation26_spill] sm:$0xff]  ;;  %v856_v8 = vld [vmem:[%s1957_s21 + $0x8d] sm:$0x1]  ;;  %v857_v0 = vld [vmem:[%s1957_s21 + $0x95] sm:$0x1]  ;;  %v872_v27 = vmul.f32 %v3454_v21, %v839_v44  ;;  %v873_v33 = vmul.f32 %v3454_v21, %v840_v53  ;;  %v874_v57 = vmul.f32 %v3454_v21, %v841_v52  ;;  %v876_v1 = vmul.f32 %v3454_v21, %v843_v9 }
  0xcf   : > { %3437 = vst [vmem:[#allocation19_spill] sm:$0xff] %v2747_v39  ;;  %v2777_v32 = vadd.f32 %v802_v62, %v3450_v14  ;;  %v855_v3 = vld [vmem:[%s1957_s21 + $0x85] sm:$0x1]  ;;  %v858_v63 = vld [vmem:[%s1957_s21 + $0x9d] sm:$0x1]  ;;  %v875_v62 = vmul.f32 %v3454_v21, %v842_v15  ;;  %v877_v12 = vmul.f32 %v3454_v21, %v844_v37  ;;  %v878_v14 = vmul.f32 %v3454_v21, %v845_v7 }
  0xd0   : > { %3439 = vst [vmem:[#allocation20_spill] sm:$0xff] %v2755_v55  ;;  %v859_v4 = vld [vmem:[%s1957_s21 + $0xa5] sm:$0x1]  ;;  %v860_v5 = vld [vmem:[%s1957_s21 + $0xad] sm:$0x1]  ;;  %v879_v44 = vmul.f32 %v3454_v21, %v846_v43  ;;  %v880_v15 = vmul.f32 %v3454_v21, %v847_v11  ;;  %v883_v9 = vmul.f32 %v3454_v21, %v850_v50  ;;  %v884_v7 = vmul.f32 %v3454_v21, %v851_v46 }
  0xd1   : > { %3441 = vst [vmem:[#allocation21_spill] sm:$0xff] %v2758_v40  ;;  %v861_v29 = vld [vmem:[%s1957_s21 + $0xb5] sm:$0x1]  ;;  %v862_v53 = vld [vmem:[%s1957_s21 + $0xbd] sm:$0x1]  ;;  %v885_v43 = vmul.f32 %v3454_v21, %v852_v13  ;;  %v890_v50 = vmul.f32 %v3454_v21, %v857_v0  ;;  %v891_v39 = vmul.f32 %v3454_v21, %v858_v63  ;;  %v892_v19 = vmul.f32 %v3454_v21, %v859_v4 }
  0xd2   : > { %3443 = vst [vmem:[#allocation22_spill] sm:$0xff] %v2761_v28  ;;  %v863_v52 = vld [vmem:[%s1957_s21 + $0xc5] sm:$0x1]  ;;  %v864_v41 = vld [vmem:[%s1957_s21 + $0xcd] sm:$0x1]  ;;  %v887_v28 = vmul.f32 %v3454_v21, %v854_v58  ;;  %v893_v46 = vmul.f32 %v3454_v21, %v860_v5  ;;  %v894_v13 = vmul.f32 %v3454_v21, %v861_v29  ;;  %v2833_v29 = vadd.f32 %v872_v27, %v2673_v51 }
  0xd3   : > { %3445 = vst [vmem:[#allocation23_spill] sm:$0xff] %v2764_v6  ;;  %v866_v37 = vld [vmem:[%s1957_s21 + $0xdd] sm:$0x1]  ;;  %v886_v6 = vmul.f32 %v3454_v21, %v853_v48  ;;  %v868_v40 = vld [vmem:[%s1957_s21 + $0xed] sm:$0x1]  ;;  %v895_v48 = vmul.f32 %v3454_v21, %v862_v53  ;;  %v896_v58 = vmul.f32 %v3454_v21, %v863_v52  ;;  %v897_v10 = vmul.f32 %v3454_v21, %v864_v41 }
  0xd4   : > { %3447 = vst [vmem:[#allocation24_spill] sm:$0xff] %v2771_v45  ;;  %v867_v45 = vld [vmem:[%s1957_s21 + $0xe5] sm:$0x1]  ;;  %v869_v55 = vld [vmem:[%s1957_s21 + $0xf5] sm:$0x1]  ;;  %v901_v63 = vmul.f32 %v3454_v21, %v868_v40  ;;  %v2836_v53 = vadd.f32 %v873_v33, %v2676_v16  ;;  %v2839_v52 = vadd.f32 %v874_v57, %v2679_v2  ;;  %v2851_v51 = vadd.f32 %v878_v14, %v2691_v54 }
  0xd5   : > { %3449 = vst [vmem:[#allocation25_spill] sm:$0xff] %v2774_v42  ;;  %v865_v42 = vld [vmem:[%s1957_s21 + $0xd5] sm:$0x1]  ;;  %v870_v11 = vld [vmem:[%s1957_s21 + $0xfd] sm:$0x1]  ;;  %v900_v0 = vmul.f32 %v3454_v21, %v867_v45  ;;  %v902_v4 = vmul.f32 %v3454_v21, %v869_v55  ;;  %v2845_v45 = vadd.f32 %v876_v1, %v2685_v34  ;;  %v2848_v55 = vadd.f32 %v877_v12, %v2688_v61 }
  0xd6   : > { %3451 = vst [vmem:[#allocation26_spill] sm:$0xff] %v2777_v32  ;;  %v882_v32 = vmul.f32 %v3454_v21, %v849_v25  ;;  %v889_v25 = vmul.f32 %v3454_v21, %v856_v8  ;;  %v899_v8 = vmul.f32 %v3454_v21, %v866_v37  ;;  %v903_v5 = vmul.f32 %v3454_v21, %v870_v11  ;;  %v945_v12 = vld [vmem:[%s1957_s21 + $0x36] sm:$0x1]  ;;  %v946_v14 = vld [vmem:[%s1957_s21 + $0x3e] sm:$0x1] }
  0xd7   : > { %3453 = vst [vmem:[#allocation27_spill] sm:$0xff] %v2780_v60  ;;  %v881_v60 = vmul.f32 %v3454_v21, %v848_v49  ;;  %v888_v49 = vmul.f32 %v3454_v21, %v855_v3  ;;  %v898_v3 = vmul.f32 %v3454_v21, %v865_v42  ;;  %v2842_v42 = vadd.f32 %v875_v62, %v2682_v31  ;;  %v3460_v21 = vld [vmem:[#allocation18_spill] sm:$0xff]  ;;  %v3464_v33 = vld [vmem:[#allocation20_spill] sm:$0xff]  ;;  %v948_v41 = vld [vmem:[%s1957_s21 + $0x4e] sm:$0x1] }
  0xd8   : > { %v2854_v16 = vadd.f32 %v879_v44, %v2694_v35  ;;  %v2857_v2 = vadd.f32 %v880_v15, %v2697_v36  ;;  %v2863_v34 = vadd.f32 %v882_v32, %v2703_v26  ;;  %v2866_v61 = vadd.f32 %v883_v9, %v2706_v56  ;;  %v944_v32 = vld [vmem:[%s1957_s21 + $0x2e] sm:$0x1]  ;;  %v3466_v62 = vld [vmem:[#allocation21_spill] sm:$0xff]  ;;  %v947_v44 = vld [vmem:[%s1957_s21 + $0x46] sm:$0x1] }
  0xd9   : > { %v2860_v31 = vadd.f32 %v881_v60, %v2700_v24  ;;  %v2869_v54 = vadd.f32 %v884_v7, %v2709_v23  ;;  %v2872_v35 = vadd.f32 %v885_v43, %v2712_v17  ;;  %v2875_v36 = vadd.f32 %v886_v6, %v2715_v30  ;;  %v939_v17 = vld [vmem:[%s1957_s21 + $0x6] sm:$0x1]  ;;  %v940_v30 = vld [vmem:[%s1957_s21 + $0xe] sm:$0x1]  ;;  %v941_v6 = vld [vmem:[%s1957_s21 + $0x16] sm:$0x1] }
  0xda   : > { %v2878_v24 = vadd.f32 %v887_v28, %v2718_v20  ;;  %v2881_v26 = vadd.f32 %v888_v49, %v2723_v18  ;;  %v2884_v56 = vadd.f32 %v889_v25, %v2726_v47  ;;  %v2887_v40 = vadd.f32 %v890_v50, %v2729_v22  ;;  %v942_v20 = vld [vmem:[%s1957_s21 + $0x1e] sm:$0x1]  ;;  %v3456_v47 = vld [vmem:[#allocation30_spill] sm:$0xff]  ;;  %v2908_v60 = vld [vmem:[%s1939_s17 + $0x1] sm:$0x1] }
  0xdb   : > { %v2890_v23 = vadd.f32 %v891_v39, %v2732_v59  ;;  %v2897_v18 = vadd.f32 %v892_v19, %v2738_v38  ;;  %v2900_v28 = vadd.f32 %v893_v46, %v3456_v47  ;;  %v943_v22 = vld [vmem:[%s1957_s21 + $0x26] sm:$0x1]  ;;  %v3458_v59 = vld [vmem:[#allocation29_spill] sm:$0xff]  ;;  %vm1036_vm7 = vcmp.gt.f32.partialorder %v2908_v60, 7.0  ;;  %v3462_v38 = vld [vmem:[#allocation19_spill] sm:$0xff] }
  0xdc   : > { %v2905_v39 = vperm.slane %v3458_v59, 0  ;;  %3459 = vst [vmem:[#allocation29_spill] sm:$0xff] %v2908_v60  ;;  %v2912_v27 = vadd.f32 %v894_v13, %v3460_v21  ;;  %v2915_v19 = vadd.f32 %v895_v48, %v3462_v38  ;;  %v2918_v57 = vadd.f32 %v896_v58, %v3464_v33  ;;  %v949_v15 = vld [vmem:[%s1957_s21 + $0x56] sm:$0x1]  ;;  %v950_v9 = vld [vmem:[%s1957_s21 + $0x5e] sm:$0x1] }
  0xdd   : > { %3455 = vst [vmem:[#allocation28_spill] sm:$0xff] %v2897_v18  ;;  %v2921_v1 = vadd.f32 %v897_v10, %v3466_v62  ;;  %v3468_v37 = vld [vmem:[#allocation22_spill] sm:$0xff]  ;;  %v3470_v43 = vld [vmem:[#allocation23_spill] sm:$0xff]  ;;  %v3472_v49 = vld [vmem:[#allocation24_spill] sm:$0xff]  ;;  %v3480_v38 = vmov 0.0  }
  0xde   : > { %3457 = vst [vmem:[#allocation30_spill] sm:$0xff] %v2900_v28  ;;  %v2930_v7 = vadd.f32 %v898_v3, %v3468_v37  ;;  %v2933_v11 = vadd.f32 %v899_v8, %v3470_v43  ;;  %v2936_v10 = vadd.f32 %v900_v0, %v3472_v49  ;;  %v3474_v25 = vld [vmem:[#allocation25_spill] sm:$0xff]  ;;  %v951_v46 = vld [vmem:[%s1957_s21 + $0x66] sm:$0x1]  ;;  %v952_v13 = vld [vmem:[%s1957_s21 + $0x6e] sm:$0x1]  ;;  %v974_v43 = vmul.f32 %v2905_v39, %v941_v6 }
  0xdf   : > { %3461 = vst [vmem:[#allocation18_spill] sm:$0xff] %v2912_v27  ;;  %v2939_v50 = vadd.f32 %v901_v63, %v3474_v25  ;;  %v953_v48 = vld [vmem:[%s1957_s21 + $0x76] sm:$0x1]  ;;  %v3476_v58 = vld [vmem:[#allocation26_spill] sm:$0xff]  ;;  %v3478_v3 = vld [vmem:[#allocation27_spill] sm:$0xff]  ;;  %v2955_v0 = vsel %vm1036_vm7, 1.0, %v3480_v38  ;;  %v975_v49 = vmul.f32 %v2905_v39, %v942_v20  ;;  %v976_v38 = vmul.f32 %v2905_v39, %v943_v22 }
  0xe0   : > { %3463 = vst [vmem:[#allocation19_spill] sm:$0xff] %v2915_v19  ;;  %v2945_v47 = vadd.f32 %v902_v4, %v3476_v58  ;;  %v2948_v59 = vadd.f32 %v903_v5, %v3478_v3  ;;  %v954_v8 = vld [vmem:[%s1957_s21 + $0x7e] sm:$0x1]  ;;  %v955_v21 = vld [vmem:[%s1957_s21 + $0x86] sm:$0x1]  ;;  %v972_v4 = vmul.f32 %v2905_v39, %v939_v17  ;;  %v973_v5 = vmul.f32 %v2905_v39, %v940_v30 }
  0xe1   : > { %3465 = vst [vmem:[#allocation20_spill] sm:$0xff] %v2918_v57  ;;  %v956_v33 = vld [vmem:[%s1957_s21 + $0x8e] sm:$0x1]  ;;  %v957_v62 = vld [vmem:[%s1957_s21 + $0x96] sm:$0x1]  ;;  %v977_v63 = vmul.f32 %v2905_v39, %v944_v32  ;;  %v979_v17 = vmul.f32 %v2905_v39, %v946_v14  ;;  %v980_v20 = vmul.f32 %v2905_v39, %v947_v44  ;;  %v981_v60 = vmul.f32 %v2905_v39, %v948_v41 }
  0xe2   : > { %3467 = vst [vmem:[#allocation21_spill] sm:$0xff] %v2921_v1  ;;  %v958_v37 = vld [vmem:[%s1957_s21 + $0x9e] sm:$0x1]  ;;  %v959_v25 = vld [vmem:[%s1957_s21 + $0xa6] sm:$0x1]  ;;  %v983_v22 = vmul.f32 %v2905_v39, %v950_v9  ;;  %v985_v14 = vmul.f32 %v2905_v39, %v952_v13  ;;  %v987_v1 = vmul.f32 %v2905_v39, %v954_v8  ;;  %v988_v41 = vmul.f32 %v2905_v39, %v955_v21 }
  0xe3   : > { %3469 = vst [vmem:[#allocation22_spill] sm:$0xff] %v2930_v7  ;;  %v960_v58 = vld [vmem:[%s1957_s21 + $0xae] sm:$0x1]  ;;  %v961_v3 = vld [vmem:[%s1957_s21 + $0xb6] sm:$0x1]  ;;  %v986_v7 = vmul.f32 %v2905_v39, %v953_v48  ;;  %v990_v9 = vmul.f32 %v2905_v39, %v957_v62  ;;  %v991_v27 = vmul.f32 %v2905_v39, %v958_v37  ;;  %v992_v28 = vmul.f32 %v2905_v39, %v959_v25 }
  0xe4   : > { %3471 = vst [vmem:[#allocation23_spill] sm:$0xff] %v2933_v11  ;;  %v962_v30 = vld [vmem:[%s1957_s21 + $0xbe] sm:$0x1]  ;;  %v963_v6 = vld [vmem:[%s1957_s21 + $0xc6] sm:$0x1]  ;;  %v994_v13 = vmul.f32 %v2905_v39, %v961_v3  ;;  %v3006_v3 = vadd.f32 %v972_v4, %v2833_v29 }
  0xe5   : > { %3473 = vst [vmem:[#allocation24_spill] sm:$0xff] %v2936_v10  ;;  %v965_v10 = vld [vmem:[%s1957_s21 + $0xd6] sm:$0x1]  ;;  %v966_v32 = vld [vmem:[%s1957_s21 + $0xde] sm:$0x1]  ;;  %v995_v48 = vmul.f32 %v2905_v39, %v962_v30  ;;  %v996_v8 = vmul.f32 %v2905_v39, %v963_v6  ;;  %v3009_v30 = vadd.f32 %v973_v5, %v2836_v53  ;;  %v3027_v53 = vadd.f32 %v979_v17, %v2854_v16 }
  0xe6   : > { %3475 = vst [vmem:[#allocation25_spill] sm:$0xff] %v2939_v50  ;;  %v982_v50 = vmul.f32 %v2905_v39, %v949_v15  ;;  %v967_v11 = vld [vmem:[%s1957_s21 + $0xe6] sm:$0x1]  ;;  %v968_v57 = vld [vmem:[%s1957_s21 + $0xee] sm:$0x1]  ;;  %v989_v15 = vmul.f32 %v2905_v39, %v956_v33  ;;  %v998_v21 = vmul.f32 %v2905_v39, %v965_v10  ;;  %v999_v33 = vmul.f32 %v2905_v39, %v966_v32 }
  0xe7   : > { %3477 = vst [vmem:[#allocation26_spill] sm:$0xff] %v2945_v47  ;;  %v964_v47 = vld [vmem:[%s1957_s21 + $0xce] sm:$0x1]  ;;  %v969_v19 = vld [vmem:[%s1957_s21 + $0xf6] sm:$0x1]  ;;  %v1000_v62 = vmul.f32 %v2905_v39, %v967_v11  ;;  %v1001_v37 = vmul.f32 %v2905_v39, %v968_v57  ;;  %v3015_v10 = vadd.f32 %v975_v49, %v2842_v42  ;;  %v3018_v11 = vadd.f32 %v976_v38, %v2845_v45 }
  0xe8   : > { %3479 = vst [vmem:[#allocation27_spill] sm:$0xff] %v2948_v59  ;;  %v978_v59 = vmul.f32 %v2905_v39, %v945_v12  ;;  %v984_v12 = vmul.f32 %v2905_v39, %v951_v46  ;;  %v970_v44 = vld [vmem:[%s1957_s21 + $0xfe] sm:$0x1]  ;;  %v993_v46 = vmul.f32 %v2905_v39, %v960_v58  ;;  %v997_v18 = vmul.f32 %v2905_v39, %v964_v47  ;;  %v3488_v4 = vld [vmem:[#allocation19_spill] sm:$0xff]  ;;  %v1049_v6 = vld [vmem:[%s1957_s21 + $0x57] sm:$0x1] }
  0xe9   : > { %v1002_v25 = vmul.f32 %v2905_v39, %v969_v19  ;;  %v1003_v58 = vmul.f32 %v2905_v39, %v970_v44  ;;  %v3012_v47 = vadd.f32 %v974_v43, %v2839_v52  ;;  %v3021_v19 = vadd.f32 %v977_v63, %v2848_v55  ;;  %v1048_v63 = vld [vmem:[%s1957_s21 + $0x4f] sm:$0x1] }
  0xea   : > { %v3024_v29 = vadd.f32 %v978_v59, %v2851_v51  ;;  %v3030_v52 = vadd.f32 %v980_v20, %v2857_v2  ;;  %v3033_v42 = vadd.f32 %v981_v60, %v2860_v31  ;;  %v3036_v45 = vadd.f32 %v982_v50, %v2863_v34  ;;  %v1040_v31 = vld [vmem:[%s1957_s21 + $0xf] sm:$0x1]  ;;  %v1041_v60 = vld [vmem:[%s1957_s21 + $0x17] sm:$0x1]  ;;  %v1042_v50 = vld [vmem:[%s1957_s21 + $0x1f] sm:$0x1] }
  0xeb   : > { %v3039_v39 = vadd.f32 %v983_v22, %v2866_v61  ;;  %v3042_v55 = vadd.f32 %v984_v12, %v2869_v54  ;;  %v3045_v51 = vadd.f32 %v985_v14, %v2872_v35  ;;  %v3048_v16 = vadd.f32 %v986_v7, %v2875_v36  ;;  %v1039_v35 = vld [vmem:[%s1957_s21 + $0x7] sm:$0x1]  ;;  %v1044_v17 = vld [vmem:[%s1957_s21 + $0x2f] sm:$0x1]  ;;  %v1050_v20 = vld [vmem:[%s1957_s21 + $0x5f] sm:$0x1] }
  0xec   : > { %v3051_v2 = vadd.f32 %v987_v1, %v2878_v24  ;;  %v3055_v34 = vadd.f32 %v988_v41, %v2881_v26  ;;  %v3058_v61 = vadd.f32 %v989_v15, %v2884_v56  ;;  %v3061_v54 = vadd.f32 %v990_v9, %v2887_v40  ;;  %v3482_v26 = vld [vmem:[#allocation28_spill] sm:$0xff]  ;;  %v3484_v56 = vld [vmem:[#allocation30_spill] sm:$0xff]  ;;  %v3496_v32 = vld [vmem:[#allocation23_spill] sm:$0xff] }
  0xed   : > { %v3066_v36 = vperm.slane %v2955_v0, 0  ;;  %v3069_v24 = vadd.f32 %v991_v27, %v2890_v23  ;;  %v3072_v57 = vadd.f32 %v992_v28, %v3482_v26  ;;  %v3075_v1 = vadd.f32 %v993_v46, %v3484_v56  ;;  %v3486_v40 = vld [vmem:[#allocation18_spill] sm:$0xff]  ;;  %v3490_v23 = vld [vmem:[#allocation20_spill] sm:$0xff]  ;;  %v3492_v28 = vld [vmem:[#allocation21_spill] sm:$0xff] }
  0xee   : > { %v3078_v7 = vadd.f32 %v994_v13, %v3486_v40  ;;  %v1043_v59 = vld [vmem:[%s1957_s21 + $0x27] sm:$0x1]  ;;  %v3085_v5 = vadd.f32 %v995_v48, %v3488_v4  ;;  %v3088_v27 = vadd.f32 %v996_v8, %v3490_v23  ;;  %v3091_v43 = vadd.f32 %v997_v18, %v3492_v28  ;;  %v3498_v14 = vld [vmem:[#allocation24_spill] sm:$0xff]  ;;  %v3500_v18 = vld [vmem:[#allocation25_spill] sm:$0xff] }
  0xef   : > { %3481 = vst [vmem:[#allocation31_spill] sm:$0xff] %v3069_v24  ;;  %v1047_v0 = vld [vmem:[%s1957_s21 + $0x47] sm:$0x1]  ;;  %v3101_v12 = vadd.f32 %v999_v33, %v3496_v32  ;;  %v3104_v44 = vadd.f32 %v1000_v62, %v3498_v14  ;;  %v3107_v41 = vadd.f32 %v1001_v37, %v3500_v18  ;;  %v1045_v15 = vld [vmem:[%s1957_s21 + $0x37] sm:$0x1]  ;;  %v3502_v13 = vld [vmem:[#allocation29_spill] sm:$0xff]  ;;  %v1072_v4 = vmul.f32 %v3066_v36, %v1039_v35 }
  0xf0   : > { %3483 = vst [vmem:[#allocation28_spill] sm:$0xff] %v3072_v57  ;;  %v3494_v49 = vld [vmem:[#allocation22_spill] sm:$0xff]  ;;  %v1046_v9 = vld [vmem:[%s1957_s21 + $0x3f] sm:$0x1]  ;;  %v1052_v46 = vld [vmem:[%s1957_s21 + $0x6f] sm:$0x1]  ;;  %v1073_v23 = vmul.f32 %v3066_v36, %v1040_v31  ;;  %v1075_v14 = vmul.f32 %v3066_v36, %v1042_v50  ;;  %v1077_v18 = vmul.f32 %v3066_v36, %v1044_v17  ;;  %v1078_v31 = vmul.f32 %v3066_v36, %v1045_v15 }
  0xf1   : > { %3485 = vst [vmem:[#allocation30_spill] sm:$0xff] %v3075_v1  ;;  %v3094_v38 = vadd.f32 %v998_v21, %v3494_v49  ;;  %v1051_v22 = vld [vmem:[%s1957_s21 + $0x67] sm:$0x1]  ;;  %v3503_v48 = vmax.f32 %v3502_v13, 1.0  ;;  %v3506_v33 = vld [vmem:[#allocation27_spill] sm:$0xff]  ;;  %v1082_v17 = vmul.f32 %v3066_v36, %v1049_v6 }
  0xf2   : > { %3487 = vst [vmem:[#allocation18_spill] sm:$0xff] %v3078_v7  ;;  %v3504_v21 = vld [vmem:[#allocation26_spill] sm:$0xff]  ;;  %v3120_v56 = vadd.f32 %v1003_v58, %v3506_v33  ;;  %v1053_v62 = vld [vmem:[%s1957_s21 + $0x77] sm:$0x1]  ;;  %v1056_v37 = vld [vmem:[%s1957_s21 + $0x8f] sm:$0x1]  ;;  %v1076_v58 = vmul.f32 %v3066_v36, %v1043_v59  ;;  %v1080_v33 = vmul.f32 %v3066_v36, %v1047_v0  ;;  %v1085_v0 = vmul.f32 %v3066_v36, %v1052_v46 }
  0xf3   : > { %3489 = vst [vmem:[#allocation19_spill] sm:$0xff] %v3085_v5  ;;  %v3114_v8 = vperm.slane %v3503_v48, 0  ;;  %v3117_v26 = vadd.f32 %v1002_v25, %v3504_v21  ;;  %v1055_v40 = vld [vmem:[%s1957_s21 + $0x87] sm:$0x1]  ;;  %v1054_v28 = vld [vmem:[%s1957_s21 + $0x7f] sm:$0x1]  ;;  %v1074_v25 = vmul.f32 %v3066_v36, %v1041_v60  ;;  %v1079_v21 = vmul.f32 %v3066_v36, %v1046_v9 }
  0xf4   : > { %3491 = vst [vmem:[#allocation20_spill] sm:$0xff] %v3088_v27  ;;  %v1057_v49 = vld [vmem:[%s1957_s21 + $0x97] sm:$0x1]  ;;  %v1058_v32 = vld [vmem:[%s1957_s21 + $0x9f] sm:$0x1]  ;;  %v1081_v60 = vmul.f32 %v3066_v36, %v1048_v63  ;;  %v1086_v63 = vmul.f32 %v3066_v36, %v1053_v62 }
  0xf5   : > { %3493 = vst [vmem:[#allocation21_spill] sm:$0xff] %v3091_v43  ;;  %v1059_v13 = vld [vmem:[%s1957_s21 + $0xa7] sm:$0x1]  ;;  %v1060_v35 = vld [vmem:[%s1957_s21 + $0xaf] sm:$0x1]  ;;  %1546 = vrcp.f32 %v3114_v8  ;;  %v1091_v5 = vmul.f32 %v3066_v36, %v1058_v32  ;;  %vm1143_vm8 = vweird.f32 %v3114_v8 }
  0xf6   : > { %3495 = vst [vmem:[#allocation22_spill] sm:$0xff] %v3094_v38  ;;  %v1061_v48 = vld [vmem:[%s1957_s21 + $0xb7] sm:$0x1]  ;;  %v1062_v50 = vld [vmem:[%s1957_s21 + $0xbf] sm:$0x1]  ;;  %v1088_v38 = vmul.f32 %v3066_v36, %v1055_v40  ;;  %v1092_v7 = vmul.f32 %v3066_v36, %v1059_v13  ;;  %v1093_v1 = vmul.f32 %v3066_v36, %v1060_v35 }
  0xf7   : > { %3497 = vst [vmem:[#allocation23_spill] sm:$0xff] %v3101_v12  ;;  %v1063_v59 = vld [vmem:[%s1957_s21 + $0xc7] sm:$0x1]  ;;  %v1065_v15 = vld [vmem:[%s1957_s21 + $0xd7] sm:$0x1]  ;;  %v1087_v12 = vmul.f32 %v3066_v36, %v1054_v28  ;;  %v1094_v46 = vmul.f32 %v3066_v36, %v1061_v48  ;;  %v1095_v62 = vmul.f32 %v3066_v36, %v1062_v50  ;;  %v1104_v48 = vadd.f32 %v1072_v4, %v3006_v3 }
  0xf8   : > { %3499 = vst [vmem:[#allocation24_spill] sm:$0xff] %v3104_v44  ;;  %v1066_v9 = vld [vmem:[%s1957_s21 + $0xdf] sm:$0x1]  ;;  %v1067_v44 = vld [vmem:[%s1957_s21 + $0xe7] sm:$0x1]  ;;  %v1096_v28 = vmul.f32 %v3066_v36, %v1063_v59  ;;  %v1098_v57 = vmul.f32 %v3066_v36, %v1065_v15  ;;  %v1105_v50 = vadd.f32 %v1073_v23, %v3009_v30  ;;  %v1106_v59 = vadd.f32 %v1074_v25, %v3012_v47 }
  0xf9   : > { %3501 = vst [vmem:[#allocation25_spill] sm:$0xff] %v3107_v41  ;;  %v1084_v41 = vmul.f32 %v3066_v36, %v1051_v22  ;;  %v1068_v43 = vld [vmem:[%s1957_s21 + $0xef] sm:$0x1]  ;;  %v1069_v27 = vld [vmem:[%s1957_s21 + $0xf7] sm:$0x1]  ;;  %v1090_v22 = vmul.f32 %v3066_v36, %v1057_v49  ;;  %v1100_v49 = vmul.f32 %v3066_v36, %v1067_v44  ;;  %v1108_v15 = vadd.f32 %v1076_v58, %v3018_v11 }
  0xfa   : > { %3505 = vst [vmem:[#allocation29_spill] sm:$0xff] %v3117_v26  ;;  %v1083_v26 = vmul.f32 %v3066_v36, %v1050_v20  ;;  %v1070_v6 = vld [vmem:[%s1957_s21 + $0xff] sm:$0x1]  ;;  %v1089_v20 = vmul.f32 %v3066_v36, %v1056_v37  ;;  %v1099_v37 = vmul.f32 %v3066_v36, %v1066_v9  ;;  %v1101_v32 = vmul.f32 %v3066_v36, %v1068_v43 }
  0xfb   : > { %3507 = vst [vmem:[#allocation26_spill] sm:$0xff] %v3120_v56  ;;  %v1064_v56 = vld [vmem:[%s1957_s21 + $0xcf] sm:$0x1]  ;;  %v1102_v13 = vmul.f32 %v3066_v36, %v1069_v27  ;;  %v1103_v35 = vmul.f32 %v3066_v36, %v1070_v6  ;;  %v1547_v24 = vpop.eup %1546  ;;  %v1109_v9 = vadd.f32 %v1077_v18, %v3021_v19  ;;  %v1110_v44 = vadd.f32 %v1078_v31, %v3024_v29 }
  0xfc   : > { %v1097_v40 = vmul.f32 %v3066_v36, %v1064_v56  ;;  %v1107_v56 = vadd.f32 %v1075_v14, %v3015_v10  ;;  %v1111_v43 = vadd.f32 %v1079_v21, %v3027_v53  ;;  %v1139_v27 = vmul.f32 %v1547_v24, %v3114_v8  ;;  %v3508_v14 = vld [vmem:[#allocation31_spill] sm:$0xff] }
  0xfd   : > { %v1112_v36 = vadd.f32 %v1080_v33, %v3030_v52  ;;  %v1113_v3 = vadd.f32 %v1081_v60, %v3033_v42  ;;  %v1114_v30 = vadd.f32 %v1082_v17, %v3036_v45  ;;  %v1149_v47 = vand.u32 2147483648, %v3114_v8 }
  0xfe   : > { %v1140_v4 = vsub.f32 1.0, %v1139_v27  ;;  %vm1144_vm9 = vweird.f32 %v1547_v24  ;;  %v1147_v10 = vand.u32 2147483647, %v3114_v8  ;;  %v1115_v11 = vadd.f32 %v1083_v26, %v3039_v39  ;;  %v3509_v8 = vld [vmem:[#allocation28_spill] sm:$0xff] }
  0xff   : > { %v1116_v19 = vadd.f32 %v1084_v41, %v3042_v55  ;;  %v1117_v29 = vadd.f32 %v1085_v0, %v3045_v51  ;;  %v1118_v53 = vadd.f32 %v1086_v63, %v3048_v16  ;;  %v1119_v52 = vadd.f32 %v1087_v12, %v3051_v2  ;;  %vm3198_vm10 = vmor %vm1143_vm8, %vm1144_vm9  ;;  %v3512_v51 = vld [vmem:[#allocation30_spill] sm:$0xff]  ;;  %v3519_v60 = vld [vmem:[#allocation24_spill] sm:$0xff] }
 0x100   : > { %v1120_v42 = vadd.f32 %v1088_v38, %v3055_v34  ;;  %v1121_v45 = vadd.f32 %v1089_v20, %v3058_v61  ;;  %v1141_v23 = vmul.f32 %v1547_v24, %v1140_v4  ;;  %v1122_v25 = vadd.f32 %v1090_v22, %v3061_v54  ;;  %v3513_v41 = vld [vmem:[#allocation18_spill] sm:$0xff]  ;;  %v3514_v34 = vld [vmem:[#allocation19_spill] sm:$0xff]  ;;  %v3515_v38 = vld [vmem:[#allocation20_spill] sm:$0xff] }
 0x101   : > { %v1123_v58 = vadd.f32 %v1091_v5, %v3508_v14  ;;  %v1124_v18 = vadd.f32 %v1092_v7, %v3509_v8  ;;  %v1150_v55 = vor.u32 1.1754944e-38, %v1149_v47  ;;  %v1125_v16 = vadd.f32 %v1093_v1, %v3512_v51  ;;  %v3516_v54 = vld [vmem:[#allocation21_spill] sm:$0xff]  ;;  %v3517_v5 = vld [vmem:[#allocation22_spill] sm:$0xff]  ;;  %v3518_v7 = vld [vmem:[#allocation23_spill] sm:$0xff] }
 0x102   : > { %v1126_v2 = vadd.f32 %v1094_v46, %v3513_v41  ;;  %v1142_v12 = vadd.f32 %v1547_v24, %v1141_v23  ;;  %vm1148_vm11 = vcmp.eq.f32.partialorder %v1147_v10, 8.507059e+37  ;;  %v1127_v61 = vadd.f32 %v1095_v62, %v3514_v34  ;;  %v3520_v0 = vld [vmem:[#allocation25_spill] sm:$0xff]  ;;  %v3522_v22 = vld [vmem:[#allocation26_spill] sm:$0xff] }
 0x103   : > { %v1128_v26 = vadd.f32 %v1096_v28, %v3515_v38  ;;  %v1129_v31 = vadd.f32 %v1097_v40, %v3516_v54  ;;  %v1130_v21 = vadd.f32 %v1098_v57, %v3517_v5  ;;  %v1131_v33 = vadd.f32 %v1099_v37, %v3518_v7  ;;  %v3521_v6 = vld [vmem:[#allocation29_spill] sm:$0xff] }
 0x104   : > { %v1132_v17 = vadd.f32 %v1100_v49, %v3519_v60  ;;  %v1133_v63 = vadd.f32 %v1101_v32, %v3520_v0  ;;  %v1146_v1 = vsel %vm3198_vm10, %v1547_v24, %v1142_v12  ;;  %v1134_v20 = vadd.f32 %v1102_v13, %v3521_v6 }
 0x105   : > { %v1135_v46 = vadd.f32 %v1103_v35, %v3522_v22  ;;  %v1151_v62 = vsel %vm1148_vm11, %v1150_v55, %v1146_v1 }
 0x106   : > { %v1152_v28 = vmul.f32 %v1151_v62, %v1104_v48  ;;  %v1153_v27 = vmul.f32 %v1151_v62, %v1105_v50  ;;  %v1154_v40 = vmul.f32 %v1151_v62, %v1106_v59  ;;  %v1155_v47 = vmul.f32 %v1151_v62, %v1107_v56 }
 0x107   : > { %v1156_v57 = vmul.f32 %v1151_v62, %v1108_v15  ;;  %v1157_v37 = vmul.f32 %v1151_v62, %v1109_v9  ;;  %v1158_v4 = vmul.f32 %v1151_v62, %v1110_v44  ;;  %v3215_v49 = vmul.f32 %v1151_v62, %v1111_v43 }
 0x108   : > { %v1160_v32 = vmul.f32 %v1151_v62, %v1112_v36  ;;  %v1161_v10 = vmul.f32 %v1151_v62, %v1113_v3  ;;  %v1162_v24 = vmul.f32 %v1151_v62, %v1114_v30  ;;  %v1163_v23 = vmul.f32 %v1151_v62, %v1115_v11 }
 0x109   : > { %v1164_v13 = vmul.f32 %v1151_v62, %v1116_v19  ;;  %v1165_v35 = vmul.f32 %v1151_v62, %v1117_v29  ;;  %v1166_v14 = vmul.f32 %v1151_v62, %v1118_v53  ;;  %v1167_v8 = vmul.f32 %v1151_v62, %v1119_v52 }
 0x10a   : > { %v1168_v48 = vmul.f32 %v1151_v62, %v1120_v42  ;;  %v1169_v50 = vmul.f32 %v1151_v62, %v1121_v45  ;;  %v1170_v59 = vmul.f32 %v1151_v62, %v1122_v25  ;;  %v1171_v56 = vmul.f32 %v1151_v62, %v1123_v58 }
 0x10b   : > { %v1172_v15 = vmul.f32 %v1151_v62, %v1124_v18  ;;  %v1173_v9 = vmul.f32 %v1151_v62, %v1125_v16  ;;  %v1174_v44 = vmul.f32 %v1151_v62, %v1126_v2  ;;  %v3217_v43 = vmul.f32 %v1151_v62, %v1127_v61 }
 0x10c   : > { %v1176_v36 = vmul.f32 %v1151_v62, %v1128_v26  ;;  %v1177_v3 = vmul.f32 %v1151_v62, %v1129_v31  ;;  %v1178_v30 = vmul.f32 %v1151_v62, %v1130_v21  ;;  %v3219_v11 = vmul.f32 %v1151_v62, %v1131_v33 }
 0x10d   : > { %v3221_v19 = vmul.f32 %v1151_v62, %v1132_v17  ;;  %v3223_v29 = vmul.f32 %v1151_v62, %v1133_v63  ;;  %v3225_v53 = vmul.f32 %v1151_v62, %v1134_v20  ;;  %v3227_v52 = vmul.f32 %v1151_v62, %v1135_v46 }
 0x10e   : > { %v1220_v42 = vrot.slane %v1153_v27, 7  ;;  %v1223_v45 = vrot.slane %v1154_v40, 6  ;;  %v1226_v25 = vrot.slane %v1155_v47, 5  ;;  %v1229_v58 = vrot.slane %v1156_v57, 4  ;;  %v1184_v57 = vld [vmem:[%s1947_s9] sm:$0xff] }
 0x10f   : > { %v1232_v18 = vrot.slane %v1157_v37, 3  ;;  %v1235_v39 = vrot.slane %v1158_v4, 2  ;;  %v1238_v55 = vrot.slane %v3215_v49, 1  ;;  %v1241_v51 = vrot.slane %v1161_v10, 7  ;;  %v1185_v10 = vld [vmem:[%s1947_s9 + $0x8] sm:$0xff] }
 0x110   : > { %v1222_v16 = vsel %vm1221_vm12, %v1220_v42, %v1152_v28  ;;  %v1243_v41 = vrot.slane %v1162_v24, 6  ;;  %v1245_v2 = vrot.slane %v1163_v23, 5  ;;  %v1247_v12 = vrot.slane %v1164_v13, 4  ;;  %v1186_v24 = vld [vmem:[%s1947_s9 + $0x10] sm:$0xff] }
 0x111   : > { %v1225_v34 = vsel %vm1224_vm13, %v1223_v45, %v1222_v16  ;;  %v1242_v61 = vsel %vm1221_vm12, %v1241_v51, %v1160_v32  ;;  %v1249_v38 = vrot.slane %v1165_v35, 3  ;;  %v1251_v26 = vrot.slane %v1166_v14, 2  ;;  %v1187_v45 = vld [vmem:[%s1947_s9 + $0x18] sm:$0xff] }
 0x112   : > { %v1228_v54 = vsel %vm1227_vm14, %v1226_v25, %v1225_v34  ;;  %v1244_v31 = vsel %vm1224_vm13, %v1243_v41, %v1242_v61  ;;  %v1253_v5 = vrot.slane %v1167_v8, 1  ;;  %v1255_v21 = vrot.slane %v1169_v50, 7 }
 0x113   : > { %v1231_v7 = vsel %vm1230_vm15, %v1229_v58, %v1228_v54  ;;  %v1246_v33 = vsel %vm1227_vm14, %v1245_v2, %v1244_v31  ;;  %v1257_v60 = vrot.slane %v1170_v59, 6  ;;  %v1259_v17 = vrot.slane %v1171_v56, 5  ;;  %v1291_v59 = vld [vmem:[%s1954_s7] sm:$0xff]  ;;  %v334_v54 = vld [vmem:[%s1939_s17] sm:$0x1] }
 0x114   : > { %v1234_v0 = vsel %vm1233_vm0, %v1232_v18, %v1231_v7  ;;  %v1248_v63 = vsel %vm1230_vm15, %v1247_v12, %v1246_v33  ;;  %v1256_v1 = vsel %vm1221_vm12, %v1255_v21, %v1168_v48  ;;  %v1261_v6 = vrot.slane %v1172_v15, 4 }
 0x115   : > { %v1237_v20 = vsel %vm1236_vm1, %v1235_v39, %v1234_v0  ;;  %v1250_v22 = vsel %vm1233_vm0, %v1249_v38, %v1248_v63  ;;  %v1258_v46 = vsel %vm1224_vm13, %v1257_v60, %v1256_v1  ;;  %v1263_v62 = vrot.slane %v1173_v9, 3 }
 0x116   : > { %v1240_v28 = vsel %vm1239_vm2, %v1238_v55, %v1237_v20  ;;  %v1252_v27 = vsel %vm1236_vm1, %v1251_v26, %v1250_v22  ;;  %v1260_v40 = vsel %vm1227_vm14, %v1259_v17, %v1258_v46  ;;  %v1265_v47 = vrot.slane %v1174_v44, 2  ;;  %v1294_v55 = vld [vmem:[%s1954_s7 + $0x18] sm:$0xff] }
 0x117   : > { %v1254_v37 = vsel %vm1239_vm2, %v1253_v5, %v1252_v27  ;;  %v1262_v4 = vsel %vm1230_vm15, %v1261_v6, %v1260_v40  ;;  %v1267_v49 = vrot.slane %v3217_v43, 1  ;;  %v1269_v32 = vrot.slane %v1177_v3, 7  ;;  %v1292_v43 = vld [vmem:[%s1954_s7 + $0x8] sm:$0xff]  ;;  %v1293_v3 = vld [vmem:[%s1954_s7 + $0x10] sm:$0xff] }
 0x118   : > { %v1264_v23 = vsel %vm1233_vm0, %v1263_v62, %v1262_v4  ;;  %v1271_v13 = vrot.slane %v1178_v30, 6  ;;  %v1273_v35 = vrot.slane %v3219_v11, 5  ;;  %v1275_v14 = vrot.slane %v3221_v19, 4 }
 0x119   : > { %v1266_v8 = vsel %vm1236_vm1, %v1265_v47, %v1264_v23  ;;  %v1270_v48 = vsel %vm1221_vm12, %v1269_v32, %v1176_v36  ;;  %v1277_v50 = vrot.slane %v3223_v29, 3  ;;  %v1279_v9 = vrot.slane %v3225_v53, 2 }
 0x11a   : > { %v1268_v56 = vsel %vm1239_vm2, %v1267_v49, %v1266_v8  ;;  %v1272_v15 = vsel %vm1224_vm13, %v1271_v13, %v1270_v48  ;;  %v1287_v44 = vadd.f32 %v1240_v28, %v1184_v57  ;;  %v1281_v11 = vrot.slane %v3227_v52, 1 }
 0x11b   : > { %v1274_v30 = vsel %vm1227_vm14, %v1273_v35, %v1272_v15  ;;  %v1288_v19 = vadd.f32 %v1254_v37, %v1185_v10  ;;  %v1289_v42 = vadd.f32 %v1268_v56, %v1186_v24 }
 0x11c   : > { %v1276_v36 = vsel %vm1230_vm15, %v1275_v14, %v1274_v30  ;;  %v1295_v29 = vmul.f32 %v1291_v59, %v1287_v44 }
 0x11d   : > { %v1278_v25 = vsel %vm1233_vm0, %v1277_v50, %v1276_v36  ;;  %v1296_v58 = vmul.f32 %v1292_v43, %v1288_v19  ;;  %v1297_v53 = vmul.f32 %v1293_v3, %v1289_v42 }
 0x11e   : > { %v1280_v18 = vsel %vm1236_vm1, %v1279_v9, %v1278_v25 }
 0x11f   : > { %v1282_v39 = vsel %vm1239_vm2, %v1281_v11, %v1280_v18  ;;  %v1299_v51 = vadd.f32 %v1296_v58, %v1295_v29 }
 0x120   : > { %v1290_v52 = vadd.f32 %v1282_v39, %v1187_v45 }
 0x121   : > { %v1300_v16 = vadd.f32 %v1299_v51, %v1297_v53 }
 0x122   : > { %v1298_v41 = vmul.f32 %v1294_v55, %v1290_v52 }
 0x124   : > { %v1301_v2 = vadd.f32 %v1300_v16, %v1298_v41 }
 0x126   : > { %v1302_v12 = vrot.slane %v1301_v2, 4 }
 0x128   : > { %v1303_v34 = vadd.f32 %v1302_v12, %v1301_v2 }
 0x12a   : > { %v1304_v61 = vrot.slane %v1303_v34, 2 }
 0x12c   : > { %v1305_v38 = vadd.f32 %v1304_v61, %v1303_v34 }
 0x12e   : > { %v1306_v26 = vrot.slane %v1305_v38, 1 }
 0x130   : > { %v1307_v31 = vadd.f32 %v1306_v26, %v1305_v38 }
 0x132   : > { %v1308_v5 = vadd.f32 %v1307_v31, %v334_v54 }
 0x134   : > { %1309 = vst [vmem:[%s333_s8] sm:$0x1] %v1308_v5 }
 0x135   : > { %1696 = shalt.err (!%p1693_p5)
}
 0x136   : > { %1489 = dma.vmem_to_hbm [thread:$0]  (%p1820_p11), %s1322_s24, 16, %s1324_s11, %s1311_s13  }
 0x137 PF: > { %s1335_s0 = sand.u32 1, %s1731_s15   ;;  %p1505_p7 = pnand %p1457_p9, %p1824_p12 }
 0x138   : > { %s1336_s30 = scalar_lea.sflag [#allocation4], %s1335_s0 }
 0x139   : > { %p1506_p8 = pneg %p1505_p7 }
 0x13b   : > { %1726 = dma.done.wait (%p1506_p8), %s1336_s30, 16  }
 0x13c   : > { %1728 = vsyncadd (%p1506_p8), %s1336_s30, 4294967280  ;;  %s3523_s18 = sld [smem:[#allocation16_spill]]  ;;  %s3526_s15 = smov %s1735_s16 }
 0x13d   : > { %s3524_s23 = sld [smem:[#allocation15_spill]] }
 0x13e   : > { %s3525_s17 = sld [smem:[#allocation17_spill]] }
 0x142   : > { %p23_p10 = scmp.ge.s32.totalorder %s3523_s18, 4  }
 0x143   : > { %s3527_s16 = smov %s3524_s23 }
 0x144   :  { %25 = sbr.rel (!%p23_p10) target bundleno = 12 (0xc), region = 118 }
 0x149   :  { %1341 = vsyncpa [#allocation3], 1 }
 0x14a   :  { %1343 = vsyncpa [#allocation3 + $0x1], 1 }
 0x14b   :  { %1344 = vsyncpa [#allocation6], 1 }
 0x14c   :  { %1346 = vsyncpa [#allocation6 + $0x1], 1 }
 0x14d   :  { %1347 = vsyncpa [#allocation9], 1 }
 0x14e   :  { %1349 = vsyncpa [#allocation9 + $0x1], 1 }
 0x14f   :  { %1350 = vsyncpa [#allocation4], 1 }
 0x150   :  { %1352 = vsyncpa [#allocation4 + $0x1], 1 }

</bundles_post_ra>
